<compile_context>
chip_gen: v5e
topology: v5e:2x2
jax: 0.10.0
libtpu: 0.0.40
codegen_flags: <defaults>
</compile_context>

<pallas_src>
import jax
import jax.numpy as jnp
from jax import lax
from jax.experimental import pallas as pl
from jax.experimental.pallas import tpu as pltpu


def _conv3x3_fused(x_flat, w_stack, bias, m9, H, W):
    """3x3 'SAME' conv on one image as a single MXU matmul.

    x_flat:  (Cin, H*W)  f32 input, spatial flattened h-major (lane-dense).
    w_stack: (Cout, 9*Cin) bf16 weights, column index k*Cin + ci, k = dy*3+dx.
    bias:    (Cout, 1) f32.
    m9:      (9, H*W) f32 0/1 boundary masks (zero where tap k would read
             outside the image); tap 4 (centre) is all ones and is skipped.
    returns  (Cout, H*W) f32.

    The per-tap spatial shift commutes with the channel matmul, so we shift
    and mask the input (XLU roll + VPU mask), stack the 9 shifted copies
    along the contraction dim, and contract all taps in ONE K = 9*Cin bf16
    matmul with f32 accumulation.
    """
    HW = H * W
    parts = []
    for dy in range(3):
        for dx in range(3):
            k = dy * 3 + dx
            s = (dy - 1) * W + (dx - 1)          # flat spatial offset of tap k
            t = x_flat
            if s != 0:
                t = pltpu.roll(t, shift=(-s) % HW, axis=1)   # XLU lane roll
            if k != 4:
                t = t * m9[k:k + 1]              # zero out-of-image taps
            parts.append(t)
    stack = jnp.concatenate(parts, axis=0).astype(jnp.bfloat16)   # (9*Cin, HW)
    y = jnp.dot(w_stack, stack, preferred_element_type=jnp.float32)
    return y + bias.astype(jnp.float32)


def _feature_agg_kernel(lq_ref, refs_ref, wlq_ref, blq_ref, wrf_ref, brf_ref,
                        masks_ref, out_ref,
                        l_sc, num_sc, den_sc):
    r = pl.program_id(1)
    C, H, W = l_sc.shape
    HW = H * W
    m9 = masks_ref[...]                                    # (9, H*W) f32

    # First reference for this batch item: compute lq_res(lq_f) once and
    # zero the accumulators.
    @pl.when(r == 0)
    def _init():
        lq_flat = lq_ref[0].astype(jnp.float32)            # (C, H*W)
        l_flat = _conv3x3_fused(lq_flat, wlq_ref[...], blq_ref[...], m9, H, W)
        l_sc[...] = l_flat.reshape(C, H, W)
        num_sc[...] = jnp.zeros_like(num_sc)
        den_sc[...] = jnp.zeros_like(den_sc)

    # ref_res(ref) for the current reference (single DMA of the raw tile).
    ref_flat = refs_ref[0, 0].astype(jnp.float32)          # (C, H*W)
    rr_flat = _conv3x3_fused(ref_flat, wrf_ref[...], brf_ref[...], m9, H, W)

    # sim = sigmoid( transpose(ref_res(ref), H<->W) @ lq_res(lq) )
    # Explicit swapaxes (XLU) kept: transposed-lhs batched dot_general does
    # not lower reliably; the transpose overlaps the MXU work anyway.
    rr_t = jnp.swapaxes(rr_flat.reshape(C, H, W), 1, 2).astype(jnp.bfloat16)
    sim = jax.nn.sigmoid(
        jnp.einsum('cih,chj->cij', rr_t, l_sc[...].astype(jnp.bfloat16),
                   preferred_element_type=jnp.float32))    # (C, W, W) f32
    sim_flat = sim.reshape(C, HW)                          # lane-dense

    num_sc[...] += sim_flat * ref_flat
    den_sc[...] += sim_flat

    @pl.when(r == pl.num_programs(1) - 1)
    def _finalize():
        inv_den = pl.reciprocal(den_sc[...], approx=True)  # EUP, free slot
        agg = num_sc[...] * inv_den + lq_ref[0].astype(jnp.float32)
        out_ref[0] = agg.astype(out_ref.dtype)


def feature_aggregation(lq_f, refs_a, w_lq, b_lq, w_ref, b_ref):
    """lq_f: (B,C,H,W); refs_a: (R,B,C,H,W); conv weights (C,C,3,3), bias (C,)."""
    R, B, C, H, W = refs_a.shape
    assert H == W, "FeatureAggregation requires square spatial dims (H == W)"
    HW = H * W

    # Glue (all cheap / layout-only): flatten spatial dims (contiguous reshape,
    # no data movement), build fused-tap weights, precompute tap masks.
    lq_flat = lq_f.reshape(B, C, HW)
    refs_flat = refs_a.reshape(R, B, C, HW)
    # w_stack[co, k*C + ci] = w[co, ci, dy, dx], k = dy*3 + dx; bf16 once.
    w_lq_s = jnp.transpose(w_lq, (0, 2, 3, 1)).reshape(C, 9 * C).astype(jnp.bfloat16)
    w_rf_s = jnp.transpose(w_ref, (0, 2, 3, 1)).reshape(C, 9 * C).astype(jnp.bfloat16)
    b_lq2 = b_lq.reshape(C, 1).astype(jnp.float32)
    b_rf2 = b_ref.reshape(C, 1).astype(jnp.float32)

    # 0/1 masks per conv tap on the flattened spatial axis (replaces padding;
    # zeros the lane wrap-around produced by the rolls).
    hh, ww = jnp.meshgrid(jnp.arange(H), jnp.arange(W), indexing="ij")
    taps = []
    for dy in range(3):
        for dx in range(3):
            ry, rx = dy - 1, dx - 1
            valid = ((hh + ry >= 0) & (hh + ry < H) &
                     (ww + rx >= 0) & (ww + rx < W))
            taps.append(valid.reshape(-1).astype(jnp.float32))
    masks9 = jnp.stack(taps)                               # (9, H*W) f32

    # Generation-aware VMEM budget: double-buffered blocks + params/masks +
    # scratch + in-kernel intermediates (tap stack, conv acc, rr, rr_t, sim).
    plane_f32 = C * HW * 4
    plane_bf16 = C * HW * 2
    blocks = 2 * 3 * plane_f32                             # lq / refs / out, x2
    params = 2 * (2 * (9 * C * C * 2) + 2 * (C * 4)) + 2 * (9 * HW * 4)
    scratch = 3 * plane_f32                                # l_sc, num, den
    inter = 9 * plane_f32 + 9 * plane_bf16 + 3 * plane_f32 + 2 * plane_bf16
    working = blocks + params + scratch + inter
    try:
        vmem_cap = pltpu.get_tpu_info().vmem_capacity_bytes
    except Exception:  # conservative fallback (valid on v7x's 64 MiB too)
        vmem_cap = 64 * 2**20
    vmem_limit = max(32 * 2**20, 2 * working)
    vmem_limit = int(min(vmem_limit, int(0.85 * vmem_cap)))

    grid_spec = pltpu.PrefetchScalarGridSpec(
        num_scalar_prefetch=0,
        grid=(B, R),
        in_specs=[
            pl.BlockSpec((1, C, HW), lambda b, r: (b, 0, 0)),        # lq (flat)
            pl.BlockSpec((1, 1, C, HW), lambda b, r: (r, b, 0, 0)),  # refs (flat)
            pl.BlockSpec((C, 9 * C), lambda b, r: (0, 0)),           # w_lq stack
            pl.BlockSpec((C, 1), lambda b, r: (0, 0)),               # b_lq
            pl.BlockSpec((C, 9 * C), lambda b, r: (0, 0)),           # w_ref stack
            pl.BlockSpec((C, 1), lambda b, r: (0, 0)),               # b_ref
            pl.BlockSpec((9, HW), lambda b, r: (0, 0)),              # tap masks
        ],
        out_specs=pl.BlockSpec((1, C, HW), lambda b, r: (b, 0, 0)),
        scratch_shapes=[
            pltpu.VMEM((C, H, W), jnp.float32),   # lq_res(lq_f), per batch item
            pltpu.VMEM((C, HW), jnp.float32),     # numerator accumulator
            pltpu.VMEM((C, HW), jnp.float32),     # denominator accumulator
        ],
    )

    out_flat = pl.pallas_call(
        _feature_agg_kernel,
        out_shape=jax.ShapeDtypeStruct((B, C, HW), lq_f.dtype),
        grid_spec=grid_spec,
        compiler_params=pltpu.CompilerParams(
            dimension_semantics=("parallel", "arbitrary"),
            vmem_limit_bytes=vmem_limit),
    )(lq_flat, refs_flat, w_lq_s, b_lq2, w_rf_s, b_rf2, masks9)

    return out_flat.reshape(B, C, H, W)


def _reference_forward(lq_f, refs_a, w_lq, b_lq, w_ref, b_ref):
    """Pure-JAX (exact f32) reference mirroring the PyTorch forward."""
    def conv(x, w, b):
        y = lax.conv_general_dilated(
            x, w, window_strides=(1, 1), padding='SAME',
            dimension_numbers=('NCHW', 'OIHW', 'NCHW'))
        return y + b[None, :, None, None]

    l = conv(lq_f, w_lq, b_lq)
    num = 0.0
    den = 0.0
    for i in range(refs_a.shape[0]):
        rr = conv(refs_a[i], w_ref, b_ref)
        rt = jnp.swapaxes(rr, 2, 3)
        sim = jax.nn.sigmoid(jnp.matmul(rt, l))
        num = num + sim * refs_a[i]
        den = den + sim
    return num / den + lq_f


if __name__ == "__main__":
    # Small deterministic example: B=2, C=4, H=W=16, R=3 references.
    B, C, H, W, R = 2, 4, 16, 16, 3
    key = jax.random.PRNGKey(0)
    k1, k2, k3, k4, k5, k6 = jax.random.split(key, 6)

    lq_f = jax.random.normal(k1, (B, C, H, W), dtype=jnp.float32)
    refs_a = jax.random.normal(k2, (R, B, C, H, W), dtype=jnp.float32)

    # Deterministic conv parameters (Conv2d(C, C, 3, padding=1) x2).
    w_lq = 0.2 * jax.random.normal(k3, (C, C, 3, 3), dtype=jnp.float32)
    b_lq = 0.1 * jax.random.normal(k4, (C,), dtype=jnp.float32)
    w_ref = 0.2 * jax.random.normal(k5, (C, C, 3, 3), dtype=jnp.float32)
    b_ref = 0.1 * jax.random.normal(k6, (C,), dtype=jnp.float32)

    out = jax.block_until_ready(
        feature_aggregation(lq_f, refs_a, w_lq, b_lq, w_ref, b_ref))
    ref = jax.block_until_ready(
        _reference_forward(lq_f, refs_a, w_lq, b_lq, w_ref, b_ref))

    assert out.shape == (B, C, H, W)
    max_err = float(jnp.max(jnp.abs(out - ref)))
    # bf16 MXU operands + approx reciprocal (per the perf review) loosen the
    # match against the exact-f32 reference; typical max abs error at these
    # shapes is ~1e-2, so the tolerance below carries generous margin.
    assert jnp.allclose(out, ref, atol=2e-1, rtol=2e-2), f"max_err={max_err}"
    print("KERNEL_OK")
</pallas_src>

<mosaic_0001>
module attributes {stable_mosaic.version = 11 : i64} {
  func.func @_feature_agg_kernel(%arg0: i32, %arg1: i32, %arg2: memref<1x4x256xf32, #tpu.memory_space<vmem>>, %arg3: memref<1x1x4x256xf32, #tpu.memory_space<vmem>>, %arg4: memref<4x36xbf16, #tpu.memory_space<vmem>>, %arg5: memref<4x1xf32, #tpu.memory_space<vmem>>, %arg6: memref<4x36xbf16, #tpu.memory_space<vmem>>, %arg7: memref<4x1xf32, #tpu.memory_space<vmem>>, %arg8: memref<9x256xf32, #tpu.memory_space<vmem>>, %arg9: memref<1x4x256xf32, #tpu.memory_space<vmem>>, %arg10: memref<4x16x16xf32, #tpu.memory_space<vmem>>, %arg11: memref<4x256xf32, #tpu.memory_space<vmem>>, %arg12: memref<4x256xf32, #tpu.memory_space<vmem>>) attributes {dimension_semantics = [#tpu.dimension_semantics<parallel>, #tpu.dimension_semantics<arbitrary>], iteration_bounds = array<i64: 2, 3>, scalar_prefetch = 0 : i64, scratch_operands = 3 : i64, tpu.core_type = #tpu.core_type<tc>, window_params = [{transform_indices = @transform_0, window_bounds = array<i64: 1, 4, 256>}, {transform_indices = @transform_1, window_bounds = array<i64: 1, 1, 4, 256>}, {pipeline_mode = #tpu.pipeline_mode<synchronous>, transform_indices = @transform_2, window_bounds = array<i64: 4, 36>}, {pipeline_mode = #tpu.pipeline_mode<synchronous>, transform_indices = @transform_3, window_bounds = array<i64: 4, 1>}, {pipeline_mode = #tpu.pipeline_mode<synchronous>, transform_indices = @transform_4, window_bounds = array<i64: 4, 36>}, {pipeline_mode = #tpu.pipeline_mode<synchronous>, transform_indices = @transform_5, window_bounds = array<i64: 4, 1>}, {pipeline_mode = #tpu.pipeline_mode<synchronous>, transform_indices = @transform_6, window_bounds = array<i64: 9, 256>}, {transform_indices = @transform_7, window_bounds = array<i64: 1, 4, 256>}]} {
    %c0 = arith.constant 0 : index
    %c0_0 = arith.constant 0 : index
    %0 = vector.load %arg8[%c0, %c0_0] : memref<9x256xf32, #tpu.memory_space<vmem>>, vector<9x256xf32>
    %c0_i32 = arith.constant 0 : i32
    %1 = arith.cmpi eq, %arg1, %c0_i32 : i32
    %2 = arith.extui %1 : i1 to i32
    %c0_i32_1 = arith.constant 0 : i32
    %3 = arith.cmpi ne, %2, %c0_i32_1 : i32
    scf.if %3 {
      %c0_24 = arith.constant 0 : index
      %c0_25 = arith.constant 0 : index
      %c0_26 = arith.constant 0 : index
      %67 = vector.load %arg2[%c0_24, %c0_25, %c0_26] : memref<1x4x256xf32, #tpu.memory_space<vmem>>, vector<1x4x256xf32>
      %68 = vector.shape_cast %67 : vector<1x4x256xf32> to vector<4x256xf32>
      %c0_27 = arith.constant 0 : index
      %c0_28 = arith.constant 0 : index
      %69 = vector.load %arg4[%c0_27, %c0_28] : memref<4x36xbf16, #tpu.memory_space<vmem>>, vector<4x36xbf16>
      %c0_29 = arith.constant 0 : index
      %c0_30 = arith.constant 0 : index
      %70 = vector.load %arg5[%c0_29, %c0_30] : memref<4x1xf32, #tpu.memory_space<vmem>>, vector<4x1xf32>
      %c17_i32_31 = arith.constant 17 : i32
      %71 = tpu.dynamic_rotate %68 by %c17_i32_31 dim 1 : vector<4x256xf32>, i32 -> vector<4x256xf32>
      %72 = vector.extract_strided_slice %0 {offsets = [0, 0], sizes = [1, 256], strides = [1, 1]} : vector<9x256xf32> to vector<1x256xf32>
      %73 = vector.broadcast %72 : vector<1x256xf32> to vector<4x256xf32>
      %74 = arith.mulf %71, %73 : vector<4x256xf32>
      %c16_i32_32 = arith.constant 16 : i32
      %75 = tpu.dynamic_rotate %68 by %c16_i32_32 dim 1 : vector<4x256xf32>, i32 -> vector<4x256xf32>
      %76 = vector.extract_strided_slice %0 {offsets = [1, 0], sizes = [1, 256], strides = [1, 1]} : vector<9x256xf32> to vector<1x256xf32>
      %77 = vector.broadcast %76 : vector<1x256xf32> to vector<4x256xf32>
      %78 = arith.mulf %75, %77 : vector<4x256xf32>
      %c15_i32_33 = arith.constant 15 : i32
      %79 = tpu.dynamic_rotate %68 by %c15_i32_33 dim 1 : vector<4x256xf32>, i32 -> vector<4x256xf32>
      %80 = vector.extract_strided_slice %0 {offsets = [2, 0], sizes = [1, 256], strides = [1, 1]} : vector<9x256xf32> to vector<1x256xf32>
      %81 = vector.broadcast %80 : vector<1x256xf32> to vector<4x256xf32>
      %82 = arith.mulf %79, %81 : vector<4x256xf32>
      %c1_i32_34 = arith.constant 1 : i32
      %83 = tpu.dynamic_rotate %68 by %c1_i32_34 dim 1 : vector<4x256xf32>, i32 -> vector<4x256xf32>
      %84 = vector.extract_strided_slice %0 {offsets = [3, 0], sizes = [1, 256], strides = [1, 1]} : vector<9x256xf32> to vector<1x256xf32>
      %85 = vector.broadcast %84 : vector<1x256xf32> to vector<4x256xf32>
      %86 = arith.mulf %83, %85 : vector<4x256xf32>
      %c255_i32_35 = arith.constant 255 : i32
      %87 = tpu.dynamic_rotate %68 by %c255_i32_35 dim 1 : vector<4x256xf32>, i32 -> vector<4x256xf32>
      %88 = vector.extract_strided_slice %0 {offsets = [5, 0], sizes = [1, 256], strides = [1, 1]} : vector<9x256xf32> to vector<1x256xf32>
      %89 = vector.broadcast %88 : vector<1x256xf32> to vector<4x256xf32>
      %90 = arith.mulf %87, %89 : vector<4x256xf32>
      %c241_i32_36 = arith.constant 241 : i32
      %91 = tpu.dynamic_rotate %68 by %c241_i32_36 dim 1 : vector<4x256xf32>, i32 -> vector<4x256xf32>
      %92 = vector.extract_strided_slice %0 {offsets = [6, 0], sizes = [1, 256], strides = [1, 1]} : vector<9x256xf32> to vector<1x256xf32>
      %93 = vector.broadcast %92 : vector<1x256xf32> to vector<4x256xf32>
      %94 = arith.mulf %91, %93 : vector<4x256xf32>
      %c240_i32_37 = arith.constant 240 : i32
      %95 = tpu.dynamic_rotate %68 by %c240_i32_37 dim 1 : vector<4x256xf32>, i32 -> vector<4x256xf32>
      %96 = vector.extract_strided_slice %0 {offsets = [7, 0], sizes = [1, 256], strides = [1, 1]} : vector<9x256xf32> to vector<1x256xf32>
      %97 = vector.broadcast %96 : vector<1x256xf32> to vector<4x256xf32>
      %98 = arith.mulf %95, %97 : vector<4x256xf32>
      %c239_i32_38 = arith.constant 239 : i32
      %99 = tpu.dynamic_rotate %68 by %c239_i32_38 dim 1 : vector<4x256xf32>, i32 -> vector<4x256xf32>
      %100 = vector.extract_strided_slice %0 {offsets = [8, 0], sizes = [1, 256], strides = [1, 1]} : vector<9x256xf32> to vector<1x256xf32>
      %101 = vector.broadcast %100 : vector<1x256xf32> to vector<4x256xf32>
      %102 = arith.mulf %99, %101 : vector<4x256xf32>
      %103 = tpu.concatenate %74, %78, %82, %86, %68, %90, %94, %98, %102 in 0 : vector<4x256xf32>, vector<4x256xf32>, vector<4x256xf32>, vector<4x256xf32>, vector<4x256xf32>, vector<4x256xf32>, vector<4x256xf32>, vector<4x256xf32>, vector<4x256xf32> -> vector<36x256xf32>
      %104 = arith.truncf %103 : vector<36x256xf32> to vector<36x256xbf16>
      %cst_39 = arith.constant dense<0.000000e+00> : vector<4x256xf32>
      %105 = tpu.matmul %69, %104, %cst_39 {dimension_numbers = #tpu.dot_dimension_numbers<[1], [0], [0], [1], [0, 0, 1, 1], [], []>} : vector<4x36xbf16>, vector<36x256xbf16>, vector<4x256xf32> -> vector<4x256xf32>
      %106 = vector.broadcast %70 : vector<4x1xf32> to vector<4x256xf32>
      %107 = arith.addf %105, %106 : vector<4x256xf32>
      %108 = vector.shape_cast %107 : vector<4x256xf32> to vector<4x16x16xf32>
      %c0_40 = arith.constant 0 : index
      %c0_41 = arith.constant 0 : index
      %c0_42 = arith.constant 0 : index
      %109 = vector.load %arg10[%c0_40, %c0_41, %c0_42] : memref<4x16x16xf32, #tpu.memory_space<vmem>>, vector<4x16x16xf32>
      tpu.vector_store %arg10[%c0_40, %c0_41, %c0_42], %108 {strides = array<i32>} : memref<4x16x16xf32, #tpu.memory_space<vmem>>, vector<4x16x16xf32>,
      %cst_43 = arith.constant 0.000000e+00 : f32
      %110 = vector.broadcast %cst_43 : f32 to vector<4x256xf32>
      %c0_44 = arith.constant 0 : index
      %c0_45 = arith.constant 0 : index
      %111 = vector.load %arg11[%c0_44, %c0_45] : memref<4x256xf32, #tpu.memory_space<vmem>>, vector<4x256xf32>
      tpu.vector_store %arg11[%c0_44, %c0_45], %110 {strides = array<i32>} : memref<4x256xf32, #tpu.memory_space<vmem>>, vector<4x256xf32>,
      %cst_46 = arith.constant 0.000000e+00 : f32
      %112 = vector.broadcast %cst_46 : f32 to vector<4x256xf32>
      %c0_47 = arith.constant 0 : index
      %c0_48 = arith.constant 0 : index
      %113 = vector.load %arg12[%c0_47, %c0_48] : memref<4x256xf32, #tpu.memory_space<vmem>>, vector<4x256xf32>
      tpu.vector_store %arg12[%c0_47, %c0_48], %112 {strides = array<i32>} : memref<4x256xf32, #tpu.memory_space<vmem>>, vector<4x256xf32>,
    } else {
    }
    %c0_2 = arith.constant 0 : index
    %c0_3 = arith.constant 0 : index
    %c0_4 = arith.constant 0 : index
    %c0_5 = arith.constant 0 : index
    %4 = vector.load %arg3[%c0_2, %c0_3, %c0_4, %c0_5] : memref<1x1x4x256xf32, #tpu.memory_space<vmem>>, vector<1x1x4x256xf32>
    %5 = vector.shape_cast %4 : vector<1x1x4x256xf32> to vector<4x256xf32>
    %c0_6 = arith.constant 0 : index
    %c0_7 = arith.constant 0 : index
    %6 = vector.load %arg6[%c0_6, %c0_7] : memref<4x36xbf16, #tpu.memory_space<vmem>>, vector<4x36xbf16>
    %c0_8 = arith.constant 0 : index
    %c0_9 = arith.constant 0 : index
    %7 = vector.load %arg7[%c0_8, %c0_9] : memref<4x1xf32, #tpu.memory_space<vmem>>, vector<4x1xf32>
    %c17_i32 = arith.constant 17 : i32
    %8 = tpu.dynamic_rotate %5 by %c17_i32 dim 1 : vector<4x256xf32>, i32 -> vector<4x256xf32>
    %9 = vector.extract_strided_slice %0 {offsets = [0, 0], sizes = [1, 256], strides = [1, 1]} : vector<9x256xf32> to vector<1x256xf32>
    %10 = vector.broadcast %9 : vector<1x256xf32> to vector<4x256xf32>
    %11 = arith.mulf %8, %10 : vector<4x256xf32>
    %c16_i32 = arith.constant 16 : i32
    %12 = tpu.dynamic_rotate %5 by %c16_i32 dim 1 : vector<4x256xf32>, i32 -> vector<4x256xf32>
    %13 = vector.extract_strided_slice %0 {offsets = [1, 0], sizes = [1, 256], strides = [1, 1]} : vector<9x256xf32> to vector<1x256xf32>
    %14 = vector.broadcast %13 : vector<1x256xf32> to vector<4x256xf32>
    %15 = arith.mulf %12, %14 : vector<4x256xf32>
    %c15_i32 = arith.constant 15 : i32
    %16 = tpu.dynamic_rotate %5 by %c15_i32 dim 1 : vector<4x256xf32>, i32 -> vector<4x256xf32>
    %17 = vector.extract_strided_slice %0 {offsets = [2, 0], sizes = [1, 256], strides = [1, 1]} : vector<9x256xf32> to vector<1x256xf32>
    %18 = vector.broadcast %17 : vector<1x256xf32> to vector<4x256xf32>
    %19 = arith.mulf %16, %18 : vector<4x256xf32>
    %c1_i32 = arith.constant 1 : i32
    %20 = tpu.dynamic_rotate %5 by %c1_i32 dim 1 : vector<4x256xf32>, i32 -> vector<4x256xf32>
    %21 = vector.extract_strided_slice %0 {offsets = [3, 0], sizes = [1, 256], strides = [1, 1]} : vector<9x256xf32> to vector<1x256xf32>
    %22 = vector.broadcast %21 : vector<1x256xf32> to vector<4x256xf32>
    %23 = arith.mulf %20, %22 : vector<4x256xf32>
    %c255_i32 = arith.constant 255 : i32
    %24 = tpu.dynamic_rotate %5 by %c255_i32 dim 1 : vector<4x256xf32>, i32 -> vector<4x256xf32>
    %25 = vector.extract_strided_slice %0 {offsets = [5, 0], sizes = [1, 256], strides = [1, 1]} : vector<9x256xf32> to vector<1x256xf32>
    %26 = vector.broadcast %25 : vector<1x256xf32> to vector<4x256xf32>
    %27 = arith.mulf %24, %26 : vector<4x256xf32>
    %c241_i32 = arith.constant 241 : i32
    %28 = tpu.dynamic_rotate %5 by %c241_i32 dim 1 : vector<4x256xf32>, i32 -> vector<4x256xf32>
    %29 = vector.extract_strided_slice %0 {offsets = [6, 0], sizes = [1, 256], strides = [1, 1]} : vector<9x256xf32> to vector<1x256xf32>
    %30 = vector.broadcast %29 : vector<1x256xf32> to vector<4x256xf32>
    %31 = arith.mulf %28, %30 : vector<4x256xf32>
    %c240_i32 = arith.constant 240 : i32
    %32 = tpu.dynamic_rotate %5 by %c240_i32 dim 1 : vector<4x256xf32>, i32 -> vector<4x256xf32>
    %33 = vector.extract_strided_slice %0 {offsets = [7, 0], sizes = [1, 256], strides = [1, 1]} : vector<9x256xf32> to vector<1x256xf32>
    %34 = vector.broadcast %33 : vector<1x256xf32> to vector<4x256xf32>
    %35 = arith.mulf %32, %34 : vector<4x256xf32>
    %c239_i32 = arith.constant 239 : i32
    %36 = tpu.dynamic_rotate %5 by %c239_i32 dim 1 : vector<4x256xf32>, i32 -> vector<4x256xf32>
    %37 = vector.extract_strided_slice %0 {offsets = [8, 0], sizes = [1, 256], strides = [1, 1]} : vector<9x256xf32> to vector<1x256xf32>
    %38 = vector.broadcast %37 : vector<1x256xf32> to vector<4x256xf32>
    %39 = arith.mulf %36, %38 : vector<4x256xf32>
    %40 = tpu.concatenate %11, %15, %19, %23, %5, %27, %31, %35, %39 in 0 : vector<4x256xf32>, vector<4x256xf32>, vector<4x256xf32>, vector<4x256xf32>, vector<4x256xf32>, vector<4x256xf32>, vector<4x256xf32>, vector<4x256xf32>, vector<4x256xf32> -> vector<36x256xf32>
    %41 = arith.truncf %40 : vector<36x256xf32> to vector<36x256xbf16>
    %cst = arith.constant dense<0.000000e+00> : vector<4x256xf32>
    %42 = tpu.matmul %6, %41, %cst {dimension_numbers = #tpu.dot_dimension_numbers<[1], [0], [0], [1], [0, 0, 1, 1], [], []>} : vector<4x36xbf16>, vector<36x256xbf16>, vector<4x256xf32> -> vector<4x256xf32>
    %43 = vector.broadcast %7 : vector<4x1xf32> to vector<4x256xf32>
    %44 = arith.addf %42, %43 : vector<4x256xf32>
    %45 = vector.shape_cast %44 : vector<4x256xf32> to vector<4x16x16xf32>
    %46 = tpu.transpose %45, [0, 2, 1] : vector<4x16x16xf32> -> vector<4x16x16xf32>
    %47 = arith.truncf %46 : vector<4x16x16xf32> to vector<4x16x16xbf16>
    %c0_10 = arith.constant 0 : index
    %c0_11 = arith.constant 0 : index
    %c0_12 = arith.constant 0 : index
    %48 = vector.load %arg10[%c0_10, %c0_11, %c0_12] : memref<4x16x16xf32, #tpu.memory_space<vmem>>, vector<4x16x16xf32>
    %49 = arith.truncf %48 : vector<4x16x16xf32> to vector<4x16x16xbf16>
    "tpu.trace_start"() <{level = 10 : i32, message = "cih,chj->cij"}> : () -> ()
    %cst_13 = arith.constant dense<0.000000e+00> : vector<4x16x16xf32>
    %50 = tpu.matmul %47, %49, %cst_13 {dimension_numbers = #tpu.dot_dimension_numbers<[2], [1], [1], [2], [0, 0, 0, 1, 1, 2], [0], [0]>} : vector<4x16x16xbf16>, vector<4x16x16xbf16>, vector<4x16x16xf32> -> vector<4x16x16xf32>
    "tpu.trace_stop"() : () -> ()
    %51 = arith.negf %50 : vector<4x16x16xf32>
    %52 = math.exp %51 : vector<4x16x16xf32>
    %cst_14 = arith.constant 1.000000e+00 : f32
    %53 = vector.broadcast %cst_14 : f32 to vector<4x16x16xf32>
    %54 = arith.addf %53, %52 : vector<4x16x16xf32>
    %55 = arith.divf %53, %54 : vector<4x16x16xf32>
    %56 = vector.shape_cast %55 : vector<4x16x16xf32> to vector<4x256xf32>
    %c0_15 = arith.constant 0 : index
    %c0_16 = arith.constant 0 : index
    %57 = vector.load %arg11[%c0_15, %c0_16] : memref<4x256xf32, #tpu.memory_space<vmem>>, vector<4x256xf32>
    %58 = arith.mulf %56, %5 : vector<4x256xf32>
    %59 = arith.addf %57, %58 : vector<4x256xf32>
    %c0_17 = arith.constant 0 : index
    %c0_18 = arith.constant 0 : index
    %60 = vector.load %arg11[%c0_17, %c0_18] : memref<4x256xf32, #tpu.memory_space<vmem>>, vector<4x256xf32>
    tpu.vector_store %arg11[%c0_17, %c0_18], %59 {strides = array<i32>} : memref<4x256xf32, #tpu.memory_space<vmem>>, vector<4x256xf32>,
    %c0_19 = arith.constant 0 : index
    %c0_20 = arith.constant 0 : index
    %61 = vector.load %arg12[%c0_19, %c0_20] : memref<4x256xf32, #tpu.memory_space<vmem>>, vector<4x256xf32>
    %62 = arith.addf %61, %56 : vector<4x256xf32>
    %c0_21 = arith.constant 0 : index
    %c0_22 = arith.constant 0 : index
    %63 = vector.load %arg12[%c0_21, %c0_22] : memref<4x256xf32, #tpu.memory_space<vmem>>, vector<4x256xf32>
    tpu.vector_store %arg12[%c0_21, %c0_22], %62 {strides = array<i32>} : memref<4x256xf32, #tpu.memory_space<vmem>>, vector<4x256xf32>,
    %c2_i32 = arith.constant 2 : i32
    %64 = arith.cmpi eq, %arg1, %c2_i32 : i32
    %65 = arith.extui %64 : i1 to i32
    %c0_i32_23 = arith.constant 0 : i32
    %66 = arith.cmpi ne, %65, %c0_i32_23 : i32
    scf.if %66 {
      %c0_24 = arith.constant 0 : index
      %c0_25 = arith.constant 0 : index
      %67 = vector.load %arg12[%c0_24, %c0_25] : memref<4x256xf32, #tpu.memory_space<vmem>>, vector<4x256xf32>
      %68 = tpu.reciprocal %67 {approx = true} : vector<4x256xf32> -> vector<4x256xf32>
      %c0_26 = arith.constant 0 : index
      %c0_27 = arith.constant 0 : index
      %69 = vector.load %arg11[%c0_26, %c0_27] : memref<4x256xf32, #tpu.memory_space<vmem>>, vector<4x256xf32>
      %70 = arith.mulf %69, %68 : vector<4x256xf32>
      %c0_28 = arith.constant 0 : index
      %c0_29 = arith.constant 0 : index
      %c0_30 = arith.constant 0 : index
      %71 = vector.load %arg2[%c0_28, %c0_29, %c0_30] : memref<1x4x256xf32, #tpu.memory_space<vmem>>, vector<1x4x256xf32>
      %72 = vector.shape_cast %71 : vector<1x4x256xf32> to vector<4x256xf32>
      %73 = arith.addf %70, %72 : vector<4x256xf32>
      %c0_31 = arith.constant 0 : index
      %c0_32 = arith.constant 0 : index
      %c0_33 = arith.constant 0 : index
      %74 = vector.load %arg9[%c0_31, %c0_32, %c0_33] : memref<1x4x256xf32, #tpu.memory_space<vmem>>, vector<1x4x256xf32>
      %75 = vector.shape_cast %74 : vector<1x4x256xf32> to vector<4x256xf32>
      %76 = vector.shape_cast %73 : vector<4x256xf32> to vector<1x4x256xf32>
      tpu.vector_store %arg9[%c0_31, %c0_32, %c0_33], %76 {strides = array<i32>} : memref<1x4x256xf32, #tpu.memory_space<vmem>>, vector<1x4x256xf32>,
    } else {
    }
    return
  }
  func.func @transform_0(%arg0: i32, %arg1: i32) -> (i32, i32, i32) {
    %c0_i32 = arith.constant 0 : i32
    %c0_i32_0 = arith.constant 0 : i32
    %c0_i32_1 = arith.constant 0 : i32
    return %arg0, %c0_i32, %c0_i32_0 : i32, i32, i32
  }
  func.func @transform_1(%arg0: i32, %arg1: i32) -> (i32, i32, i32, i32) {
    %c0_i32 = arith.constant 0 : i32
    %c0_i32_0 = arith.constant 0 : i32
    %c0_i32_1 = arith.constant 0 : i32
    return %arg1, %arg0, %c0_i32, %c0_i32_0 : i32, i32, i32, i32
  }
  func.func @transform_2(%arg0: i32, %arg1: i32) -> (i32, i32) {
    %c0_i32 = arith.constant 0 : i32
    %c0_i32_0 = arith.constant 0 : i32
    %c0_i32_1 = arith.constant 0 : i32
    return %c0_i32, %c0_i32_0 : i32, i32
  }
  func.func @transform_3(%arg0: i32, %arg1: i32) -> (i32, i32) {
    %c0_i32 = arith.constant 0 : i32
    %c0_i32_0 = arith.constant 0 : i32
    %c0_i32_1 = arith.constant 0 : i32
    return %c0_i32, %c0_i32_0 : i32, i32
  }
  func.func @transform_4(%arg0: i32, %arg1: i32) -> (i32, i32) {
    %c0_i32 = arith.constant 0 : i32
    %c0_i32_0 = arith.constant 0 : i32
    %c0_i32_1 = arith.constant 0 : i32
    return %c0_i32, %c0_i32_0 : i32, i32
  }
  func.func @transform_5(%arg0: i32, %arg1: i32) -> (i32, i32) {
    %c0_i32 = arith.constant 0 : i32
    %c0_i32_0 = arith.constant 0 : i32
    %c0_i32_1 = arith.constant 0 : i32
    return %c0_i32, %c0_i32_0 : i32, i32
  }
  func.func @transform_6(%arg0: i32, %arg1: i32) -> (i32, i32) {
    %c0_i32 = arith.constant 0 : i32
    %c0_i32_0 = arith.constant 0 : i32
    %c0_i32_1 = arith.constant 0 : i32
    return %c0_i32, %c0_i32_0 : i32, i32
  }
  func.func @transform_7(%arg0: i32, %arg1: i32) -> (i32, i32, i32) {
    %c0_i32 = arith.constant 0 : i32
    %c0_i32_0 = arith.constant 0 : i32
    %c0_i32_1 = arith.constant 0 : i32
    return %arg0, %c0_i32, %c0_i32_0 : i32, i32, i32
  }
}

</mosaic_0001>

<bundles_post_ra>
// kernel: tpu_custom_call.1
= control target key start
LH: loop header
LB: loop body
LE: loop exit
PB: predicated region body
PF: predicated region fallthrough
CT: control target
= control target key end

     0   :  { %s3238_s0 = inlined_call_operand.hbm [shape: f32[2,4,256], index: 0, kind: input, shape index: {}]   ;;  %s3239_s1 = inlined_call_operand.hbm [shape: f32[3,2,4,256], index: 1, kind: input, shape index: {}]   ;;  %s3240_s2 = inlined_call_operand.vmem [shape: bf16[4,36], index: 2, kind: input, shape index: {}]   ;;  %s3241_s3 = inlined_call_operand.vmem [shape: f32[4,1], index: 3, kind: input, shape index: {}]   ;;  %s3242_s4 = inlined_call_operand.vmem [shape: bf16[4,36], index: 4, kind: input, shape index: {}]   ;;  %s3243_s5 = inlined_call_operand.vmem [shape: f32[4,1], index: 5, kind: input, shape index: {}]   ;;  %s3244_s6 = inlined_call_operand.hbm [shape: f32[9,256], index: 6, kind: input, shape index: {}]   ;;  %s3245_s7 = inlined_call_operand.hbm [shape: f32[2,4,256], index: 7, kind: output, shape index: {}]  }
   0x1   :  { %3254 = sst [smem:[#allocation23_spill]] %s3238_s0 }
   0x2   :  { %3255 = sst [smem:[#allocation24_spill]] %s3240_s2 }
   0x3   :  { %3256 = sst [smem:[#allocation25_spill]] %s3241_s3 }
   0x4   :  { %3257 = sst [smem:[#allocation26_spill]] %s3242_s4 }
   0x5   :  { %3258 = sst [smem:[#allocation27_spill]] %s3243_s5 }
   0x6   :  { %3259 = sst [smem:[#allocation28_spill]] %s3244_s6 }
   0x7   :  { %3260 = sst [smem:[#allocation29_spill]] %s3245_s7 }
   0x8   :  { %12 = vsyncpa [#allocation6], 0 }
   0x9   :  { %14 = vsyncpa [#allocation6 + $0x1], 0 }
   0xa   :  { %15 = vsyncpa [#allocation9], 0 }
   0xb   :  { %17 = vsyncpa [#allocation9 + $0x1], 0 }
   0xc   :  { %18 = vsyncpa [#allocation7], 0 }
   0xd   :  { %20 = vsyncpa [#allocation7 + $0x1], 0  ;;  %s2505_s24 = smov 0   ;;  %s2507_s25 = smov 0  }
   0xe   :  { %s2509_s26 = smov 0   ;;  %s2511_s27 = smov 0  }
   0xf   :  { %s2513_s28 = smov 0   ;;  %s2515_s29 = smov 0  }
  0x10   :  { %s2517_s30 = smov 0   ;;  %s2519_s8 = smov 0  }
  0x11   :  { %s2521_s9 = smov 0   ;;  %s2523_s10 = smov 0  }
  0x12   :  { %s2525_s11 = smov 0  }
  0x13 LB: > { %3261 = sst [smem:[#allocation16_spill]] %s2399_s27  ;;  %s2561_s12 = sadd.s32 4294967295, %s2427_s11   ;;  %s2427_s11 = sphi %s2525_s11, %s26_s11   ;;  %s2423_s10 = sphi %s2523_s10, %s3326_s10   ;;  %s2419_s9 = sphi %s2521_s9, %s3325_s9   ;;  %s2415_s8 = sphi %s2519_s8, %s3324_s8   ;;  %s2411_s30 = sphi %s2517_s30, %s3323_s30   ;;  %s2407_s29 = sphi %s2515_s29, %s3322_s29   ;;  %s2403_s28 = sphi %s2513_s28, %s3321_s28   ;;  %s2399_s27 = sphi %s2511_s27, %s3320_s27   ;;  %s2395_s26 = sphi %s2509_s26, %s3319_s26   ;;  %s2391_s25 = sphi %s2507_s25, %s3318_s25   ;;  %s2387_s24 = sphi %s2505_s24, %s3317_s24  }
  0x14   : > { %3262 = sst [smem:[#allocation17_spill]] %s2411_s30  ;;  %p1917_p0 = scmp.ge.s32.totalorder %s2427_s11, 1 }
  0x15   : > { %3263 = sst [smem:[#allocation18_spill]] %s2415_s8  ;;  %p59_p1 = scmp.eq.s32.totalorder %s2561_s12, 0 }
  0x16   : > { %p228_p2 = scmp.lt.s32.totalorder %s2427_s11, 7  ;;  %s3264_s6 = sld [smem:[#allocation28_spill]] }
  0x17   : > { %s2429_s17 = smov [#allocation10]   ;;  %s2430_s19 = smov 256  }
  0x18   : > { %p2569_p3 = pnand %p1917_p0, %p228_p2  ;;  %s253_s18 = sshll.u32 %s2429_s17, 4  ;;  %s254_s18 = int_to_ptr.vmem [resolvable:$true] %s253_s18 }
  0x19   : > { %s2431_s20 = smov 16   ;;  %s1916_s21 = sadd.s32 4294967294, %s2427_s11  }
  0x1a   : > { %p1967_p4 = pneg %p2569_p3  ;;  %p52_p6 = scmp.ne.s32.totalorder %s2407_s29, %s2403_s28 }
  0x1b   : > { %p53_p7 = scmp.eq.s32.totalorder %s2427_s11, 0  ;;  %p58_p8 = scmp.ne.s32.totalorder %s2403_s28, %s2399_s27 }
  0x1c   : > { %s251_s15 = sshll.u32 %s3264_s6, 4  ;;  %p1968_p5 = pnand %p1967_p4, %p59_p1  ;;  %s252_s15 = int_to_ptr.hbm [resolvable:$true] %s251_s15 }
  0x1d   : > { %p215_p9 = scmp.eq.s32.totalorder %s2561_s12, 5  ;;  %p2588_p10 = por %p53_p7, %p52_p6 }
  0x1e   : > { %1970 = dma.hbm_to_vmem [thread:$0]  (!%p1968_p5), %s252_s15, 512, %s254_s18, [#allocation9], %s2430_s19, %s2430_s19, %s2431_s20  }
  0x1f   : > { %p221_p11 = scmp.eq.s32.totalorder %s1916_s21, 5  ;;  %p2594_p12 = por %p59_p1, %p58_p8 }
  0x20   : > { %p2598_p13 = por %p215_p9, %p52_p6  ;;  %p1983_p2 = scmp.lt.s32.totalorder %s2427_s11, 6 }
  0x21   : > { %p2602_p0 = por %p221_p11, %p58_p8  ;;  %s267_s18 = sand.u32 1, %s2407_s29  }
  0x22   : > { %s3268_s15 = scalar_select %p2598_p13, 1, 0 }
  0x23   : > { %s3270_s17 = scalar_select %p2602_p0, 1, 0 }
  0x24   : > { %3269 = sst [smem:[#allocation19_spill]] %s3268_s15  ;;  %s1955_s19 = sshll.u32 %s2423_s10, 3 }
  0x25   : > { %3271 = sst [smem:[#allocation20_spill]] %s3270_s17  ;;  %s1920_s20 = sshll.u32 %s267_s18, 3 }
  0x26   : > { %s3272_s0 = sld [smem:[#allocation23_spill]]  ;;  %s271_s27 = scalar_lea.vmem [#allocation5], %s1920_s20 }
  0x27   : > { %s280_s17 = sshll.u32 %s271_s27, 4  ;;  %p1972_p4 = pnand %p1983_p2, %p2588_p10  ;;  %s281_s17 = int_to_ptr.vmem [resolvable:$true] %s280_s17 }
  0x28   : > { %s268_s7 = scalar_lea.sflag [#allocation6], %s267_s18  ;;  %s35_s15 = sadd.s32 1, %s2419_s9 }
  0x29   : > { %s73_s23 = sadd.s32 1, %s2395_s26  ;;  %p36_p5 = scmp.ge.s32.totalorder %s35_s15, 3 }
  0x2a   : > { %p80_p6 = scmp.ne.s32.totalorder %s2395_s26, %s2391_s25  ;;  %p86_p8 = scmp.ne.s32.totalorder %s2391_s25, %s2387_s24 }
  0x2b   : > { %s3328_s15 = smov (%p36_p5, %s35_s15), 0  ;;  %s3274_s27 = sadd.s32 1, %s2423_s10 }
  0x2c   : > { %s276_s22 = scalar_lea.hbm %s3272_s0, %s1955_s19  ;;  %3273 = sst [smem:[#allocation21_spill]] %s3328_s15 }
  0x2d   : > { %s278_s6 = sshll.u32 %s276_s22, 4  ;;  %s287_s22 = sand.u32 1, %s2427_s11   ;;  %s279_s6 = int_to_ptr.hbm [resolvable:$true] %s278_s6 }
  0x2e   : > { %1974 = dma.hbm_to_vmem [thread:$0]  (!%p1972_p4), %s279_s6, 128, %s281_s17, %s268_s7  }
  0x2f   : > { %s3330_s27 = smov (!%p36_p5, %s3274_s27), %s2423_s10  ;;  %s68_s13 = ssub.s32 %s2419_s9, %s3328_s15 }
  0x30   : > { %p2632_p9 = por %p80_p6, %p53_p7  ;;  %p40_p10 = scmp.ge.s32.totalorder %s3330_s27, 2 }
  0x31   : > { %p2638_p11 = por %p86_p8, %p59_p1  ;;  %s289_s24 = sand.u32 1, %s2395_s26  }
  0x32   : > { %s3332_s27 = smov (%p40_p10, %s3330_s27), 0  ;;  %s1923_s17 = sshll.u32 %s289_s24, 3 }
  0x33   : > { %s3276_s7 = scalar_select %p2638_p11, 1, 0 }
  0x34   : > { %s1924_s18 = sshll.u32 %s2423_s10, 1  ;;  %s42_s19 = ssub.s32 %s2423_s10, %s3332_s27 }
  0x35   : > { %3277 = sst [smem:[#allocation22_spill]] %s3276_s7  ;;  %p43_p4 = scmp.eq.s32.totalorder %s42_s19, 0 }
  0x36   : > { %s70_s20 = sor.u32 %s68_s13, %s42_s19  ;;  %s1925_s21 = sshll.u32 %s2419_s9, 2 }
  0x37   : > { %p71_p7 = scmp.eq.s32.totalorder %s70_s20, 0  ;;  %s3278_s0 = sadd.s32 1, %s2407_s29 }
  0x38   : > { %s2652_s15 = scalar_select %p43_p4, %s2407_s29, %s3278_s0  }
  0x39   : > { %s2655_s8 = scalar_select %p71_p7, %s2395_s26, %s73_s23  }
  0x3a   : > { %s296_s4 = sadd.s32 %s1925_s21, %s1924_s18  ;;  %s291_s5 = scalar_lea.vmem [#allocation8], %s1923_s17 }
  0x3b   : > { %s302_s2 = sshll.u32 %s291_s5, 4  ;;  %s1926_s3 = sshll.u32 %s296_s4, 2  ;;  %s303_s2 = int_to_ptr.vmem [resolvable:$true] %s302_s2 }
  0x3c   : > { %s298_s24 = scalar_lea.hbm %s3239_s1, %s1926_s3  ;;  %p1975_p5 = pnand %p1983_p2, %p2632_p9 }
  0x3d   : > { %s300_s13 = sshll.u32 %s298_s24, 4  ;;  %s288_s19 = scalar_lea.sflag [#allocation9], %s287_s22  ;;  %s301_s13 = int_to_ptr.hbm [resolvable:$true] %s300_s13 }
  0x3e   : > { %1977 = dma.hbm_to_vmem [thread:$0]  (!%p1975_p5), %s301_s13, 128, %s303_s2, %s288_s19  }
  0x3f   : > { %311 = sbr.rel (%p2569_p3) target bundleno = 1669 (0x685), region = 48  ;;  %s2667_s0 = sand.u32 (!%p2569_p3), 1, %s2403_s28  }
  0x40   : > { %s1928_s4 = sshll.u32 (!%p2569_p3), %s2667_s0, 3  ;;  %s314_s5 = scalar_lea.sflag (!%p2569_p3), [#allocation6], %s2667_s0 }
  0x41   : > { %s2671_s30 = scalar_lea.vmem (!%p2569_p3), [#allocation5], %s1928_s4 }
  0x44   : > { %2370 = dma.done.wait (%p2594_p12), %s314_s5, 128  }
  0x45   : > { %2372 = vsyncadd (%p2594_p12), %s314_s5, 4294967168  ;;  %s323_s3 = sand.u32 1, %s2561_s12   ;;  %s325_s16 = sand.u32 1, %s2391_s25  }
  0x46   : > { %s2679_s23 = sshll.u32 %s325_s16, 3  ;;  %s324_s22 = scalar_lea.sflag [#allocation9], %s323_s3 }
  0x47   : > { %s327_s6 = scalar_lea.vmem [#allocation8], %s2679_s23 }
  0x48   : > { %2374 = dma.done.wait (%p2638_p11), %s324_s22, 128  }
  0x49   : > { %2376 = vsyncadd (%p2638_p11), %s324_s22, 4294967168 }
  0x4a   : > { %2378 = dma.done.wait (%p59_p1), [#allocation9], 512  }
  0x4b   : > { %2380 = vsyncadd (%p59_p1), [#allocation9], 4294966784  ;;  %v2690_v0 = vld [vmem:[#allocation10] sm:$0xff]  ;;  %v2692_v1 = vld [vmem:[#allocation10 + $0x8] sm:$0xff]  ;;  %s2698_s14 = scalar_lea.vmem [#allocation11], %s1928_s4  ;;  %s3280_s7 = sld [smem:[#allocation17_spill]] }
  0x4c   : > { %v2694_v2 = vld [vmem:[#allocation10 + $0x10] sm:$0x1]  ;;  %v2696_v3 = vld [vmem:[#allocation10 + $0x18] sm:$0x1] }
  0x51   : > { %p1932_p3 = scmp.ne.s32.totalorder %s3280_s7, 0 }
  0x52   : > { %s2432_s12 = smov (!%p1932_p3), 17   ;;  %s2433_s17 = smov (!%p1932_p3), 16  }
  0x53   : > { %377 = sbr.rel (%p1932_p3) target bundleno = 580 (0x244), region = 64  ;;  %s2434_s18 = smov (!%p1932_p3), 1  }
  0x54   : > { %s2435_s20 = smov (!%p1932_p3), 127   ;;  %s2436_s21 = smov (!%p1932_p3), 113  }
  0x55   : > { %s2437_s24 = smov (!%p1932_p3), 112   ;;  %s2438_s13 = smov (!%p1932_p3), 111  }
  0x56   : > { %s2439_s19 = smov (!%p1932_p3), 15   ;;  %s3281_s2 = sld [smem:[#allocation25_spill]] (!%p1932_p3) }
  0x57   : > { %s3282_s22 = sld [smem:[#allocation24_spill]] (!%p1932_p3)  ;;  %s2441_s7 = smov (!%p1932_p3), 32  }
  0x58   : > { %v378_v4 = vld [vmem:[%s2671_s30] sm:$0xff]  ;;  %v391_v28 = vlaneseq  ;;  %v2440_v33 = vmov 0   ;;  %v412_v35 = vperm.slane %v2690_v0, 1  ;;  %v413_v36 = vperm.slane %v2692_v1, 1 }
  0x59   : > { %382 = vst [vmem:[#allocation1] ss:$2 sm:$0xff] %v378_v4  ;;  %2111 = vset.pattern.permute.xlu1 %v2440_v33  ;;  %2112 = vset.pattern.permute.xlu0 %v2440_v33  ;;  %v492_v39 = vperm.slane %v2690_v0, 7  ;;  %v493_v40 = vperm.slane %v2692_v1, 7  ;;  %v460_v43 = vperm.slane %v2690_v0, 5  ;;  %v461_v44 = vperm.slane %v2692_v1, 5 }
  0x5a   : > { %v2710_v31 = vand.u32 127, %v391_v28  ;;  %v444_v47 = vperm.slane %v2690_v0, 3  ;;  %v445_v50 = vperm.slane %v2692_v1, 3  ;;  %v476_v55 = vperm.slane %v2690_v0, 6 }
  0x5b   : > { %v477_v58 = vperm.slane %v2692_v1, 6  ;;  %v396_v59 = vperm.slane %v2690_v0, 0  ;;  %v508_v60 = vperm.slane %v2694_v2, 0  ;;  %v509_v61 = vperm.slane %v2696_v3, 0 }
  0x5c   : > { %v380_v32 = vld [vmem:[%s3281_s2] sm:$0xf]  ;;  %vm409_vm0 = vcmp.lt.s32.totalorder %v2710_v31, 16  ;;  %vm489_vm1 = vcmp.lt.s32.totalorder %v2710_v31, 112  ;;  %vm457_vm2 = vcmp.lt.s32.totalorder %v2710_v31, 127  ;;  %vm441_vm3 = vcmp.lt.s32.totalorder %v2710_v31, 1 }
  0x5d   : > { %vm473_vm4 = vcmp.lt.s32.totalorder %v2710_v31, 113  ;;  %vm393_vm5 = vcmp.lt.s32.totalorder %v2710_v31, 17  ;;  %vm505_vm6 = vcmp.lt.s32.totalorder %v2710_v31, 111  ;;  %vm541_vm7 = vcmask 1043456  }
  0x5e   : > { %vm565_vm8 = vcmask 1041408   ;;  %vm425_vm9 = vcmp.lt.s32.totalorder %v2710_v31, 15  ;;  %v379_v31 = vld [vmem:[%s3282_s22] sm:$0x3]  ;;  %vm561_vm10 = vcmask 293888   ;;  %vm643_vm11 = vcmask 1047556  }
  0x5f   : > { %vm755_vm12 = vcmask 130048  }
  0x60   : > { %v383_v5 = vld.sshfl [vmem:[#allocation1] sm:$0xff pattern:$0x75316420]  ;;  %v384_v6 = vld.sshfl [vmem:[#allocation1 + $0x8] sm:$0xff pattern:$0x75316420] }
  0x61   : > { %400 = vst [vmem:[#allocation1] ss:$2 sm:$0xff] %v378_v4  ;;  %387 = vrot.lane.b32.xlu0 %v383_v5, %s2432_s12 }
  0x68   : > { %v401_v7 = vld.sshfl [vmem:[#allocation1] sm:$0xff pattern:$0x75316420]  ;;  %v402_v8 = vld.sshfl [vmem:[#allocation1 + $0x8] sm:$0xff pattern:$0x75316420] }
  0x69   : > { %416 = vst [vmem:[#allocation1] ss:$2 sm:$0xff] %v378_v4  ;;  %407 = vrot.lane.b32.xlu0 %v402_v8, %s2433_s17  ;;  %405 = vrot.lane.b32.xlu2 %v401_v7, %s2433_s17 }
  0x70   : > { %v417_v9 = vld.sshfl [vmem:[#allocation1] sm:$0xff pattern:$0x75316420]  ;;  %v418_v10 = vld.sshfl [vmem:[#allocation1 + $0x8] sm:$0xff pattern:$0x75316420] }
  0x71   : > { %432 = vst [vmem:[#allocation1] ss:$2 sm:$0xff] %v378_v4 }
  0x78   : > { %v433_v11 = vld.sshfl [vmem:[#allocation1] sm:$0xff pattern:$0x75316420]  ;;  %v434_v12 = vld.sshfl [vmem:[#allocation1 + $0x8] sm:$0xff pattern:$0x75316420] }
  0x79   : > { %437 = vrot.lane.b32.xlu1 %v433_v11, %s2434_s18  ;;  %448 = vst [vmem:[#allocation1] ss:$2 sm:$0xff] %v378_v4  ;;  %439 = vrot.lane.b32.xlu2 %v434_v12, %s2434_s18  ;;  %s2443_s18 = smov 96  }
  0x80   : > { %v449_v13 = vld.sshfl [vmem:[#allocation1] sm:$0xff pattern:$0x75316420]  ;;  %v450_v14 = vld.sshfl [vmem:[#allocation1 + $0x8] sm:$0xff pattern:$0x75316420] }
  0x81   : > { %453 = vrot.lane.b32.xlu1 %v449_v13, %s2435_s20  ;;  %464 = vst [vmem:[#allocation1] ss:$2 sm:$0xff] %v378_v4 }
  0x88   : > { %v466_v15 = vld.sshfl [vmem:[#allocation1 + $0x8] sm:$0xff pattern:$0x75316420]  ;;  %v465_v16 = vld.sshfl [vmem:[#allocation1] sm:$0xff pattern:$0x75316420] }
  0x89   : > { %455 = vrot.lane.b32.xlu1 %v450_v14, %s2435_s20  ;;  %469 = vrot.lane.b32.xlu0 %v465_v16, %s2436_s21  ;;  %480 = vst [vmem:[#allocation1] ss:$2 sm:$0xff] %v378_v4  ;;  %s2444_s20 = smov 48  }
  0x90   : > { %v481_v17 = vld.sshfl [vmem:[#allocation1] sm:$0xff pattern:$0x75316420]  ;;  %v482_v18 = vld.sshfl [vmem:[#allocation1 + $0x8] sm:$0xff pattern:$0x75316420] }
  0x91   : > { %471 = vrot.lane.b32.xlu1 %v466_v15, %s2436_s21  ;;  %496 = vst [vmem:[#allocation1] ss:$2 sm:$0xff] %v378_v4  ;;  %485 = vrot.lane.b32.xlu2 %v481_v17, %s2437_s24  ;;  %s2445_s21 = smov 64  }
  0x98   : > { %v497_v19 = vld.sshfl [vmem:[#allocation1] sm:$0xff pattern:$0x75316420]  ;;  %v498_v20 = vld.sshfl [vmem:[#allocation1 + $0x8] sm:$0xff pattern:$0x75316420] }
  0x99   : > { %389 = vrot.lane.b32.xlu1 %v384_v6, %s2432_s12  ;;  %501 = vrot.lane.b32.xlu0 %v497_v19, %s2438_s13  ;;  %524 = vst [vmem:[#allocation1] ss:$2 sm:$0xff] %v378_v4  ;;  %v397_v4 = vperm.slane %v2692_v1, 0  ;;  %s2442_s12 = smov 80  }
  0x9a   : > { %487 = vrot.lane.b32.xlu2 %v482_v18, %s2437_s24 }
  0xa0   : > { %v525_v19 = vld.sshfl [vmem:[#allocation1] sm:$0xff pattern:$0x75316420] }
  0xa1   : > { %503 = vrot.lane.b32.xlu0 %v498_v20, %s2438_s13  ;;  %558 = vperm.xlu1 %2111, %v380_v32   ;;  %v526_v20 = vld.sshfl [vmem:[#allocation1 + $0x8] sm:$0xff pattern:$0x75316420] }
  0xa2   : > { %421 = vrot.lane.b32.xlu2 %v417_v9, %s2439_s19 }
  0xa9   : > { %423 = vrot.lane.b32.xlu0 %v418_v10, %s2439_s19 }
  0xc3   : > { %v406_v21 = vpop.permute.xlu2 %405 }
  0xd3   : > { %v2708_v23 = vpop.permute.xlu0 %387  ;;  %v440_v24 = vpop.permute.xlu2 %439 }
  0xdb   : > { %v408_v26 = vpop.permute.xlu0 %407 }
  0xdc   : > { %v410_v37 = vsel %vm409_vm0, %v406_v21, %v408_v26  ;;  %v411_v38 = vsel %vm409_vm0, %v408_v26, %v406_v21  ;;  %v428_v26 = vperm.slane %v2690_v0, 2 }
  0xdd   : > { %v2727_v51 = vmul.f32 %v412_v35, %v411_v38  ;;  %v2729_v52 = vmul.f32 %v413_v36, %v410_v37 }
  0xdf   : > { %v514_v38 = vrot.slane %v2727_v51, 4 }
  0xeb   : > { %v438_v22 = vpop.permute.xlu1 %437  ;;  %v486_v27 = vpop.permute.xlu2 %485 }
  0xec   : > { %v442_v5 = vsel %vm441_vm3, %v438_v22, %v440_v24  ;;  %v443_v6 = vsel %vm441_vm3, %v440_v24, %v438_v22 }
  0xed   : > { %v446_v21 = vmul.f32 %v444_v47, %v443_v6 }
  0xf3   : > { %v454_v25 = vpop.permute.xlu1 %453 }
  0xf4   : > { %v488_v34 = vpop.permute.xlu2 %487 }
  0xf5   : > { %v490_v45 = vsel %vm489_vm1, %v486_v27, %v488_v34  ;;  %v491_v46 = vsel %vm489_vm1, %v488_v34, %v486_v27  ;;  %v429_v27 = vperm.slane %v2692_v1, 2 }
  0xf6   : > { %v494_v53 = vmul.f32 %v492_v39, %v490_v45  ;;  %v495_v54 = vmul.f32 %v493_v40, %v491_v46  ;;  %v515_v39 = vrot.slane %v2729_v52, 4  ;;  %v520_v46 = vrot.slane %v446_v21, 4 }
  0xf8   : > { %v537_v7 = vrot.slane %v494_v53, 4  ;;  %v538_v8 = vrot.slane %v495_v54, 4 }
  0xfb   : > { %v456_v29 = vpop.permute.xlu1 %455  ;;  %v470_v30 = vpop.permute.xlu0 %469 }
  0xfc   : > { %v458_v48 = vsel %vm457_vm2, %v454_v25, %v456_v29  ;;  %v459_v49 = vsel %vm457_vm2, %v456_v29, %v454_v25  ;;  %v447_v25 = vmul.f32 %v445_v50, %v442_v5  ;;  %v422_v35 = vpop.permute.xlu2 %421 }
  0xfd   : > { %v462_v56 = vmul.f32 %v460_v43, %v458_v48  ;;  %v463_v57 = vmul.f32 %v461_v44, %v459_v49 }
  0xfe   : > { %v521_v47 = vrot.slane %v447_v25, 4 }
  0xff   : > { %v531_v10 = vrot.slane %v462_v56, 4  ;;  %v532_v11 = vrot.slane %v463_v57, 4 }
 0x101   : > { %v547_v32 = vsel %vm541_vm7, %v526_v20, %v532_v11 }
 0x103   : > { %v472_v41 = vpop.permute.xlu1 %471 }
 0x104   : > { %v474_v62 = vsel %vm473_vm4, %v470_v30, %v472_v41  ;;  %v475_v63 = vsel %vm473_vm4, %v472_v41, %v470_v30  ;;  %v546_v30 = vsel %vm541_vm7, %v525_v19, %v531_v10  ;;  %v2446_v10 = vmov 1983009808  }
 0x105   : > { %v478_v14 = vmul.f32 %v476_v55, %v474_v62  ;;  %v479_v15 = vmul.f32 %v477_v58, %v475_v63  ;;  %v646_v11 = vunpack.c.l.s4 %v2446_v10 }
 0x107   : > { %v548_v36 = vsel %vm541_vm7, %v478_v14, %v537_v7  ;;  %v549_v37 = vsel %vm541_vm7, %v479_v15, %v538_v8 }
 0x108   : > { %v552_v44 = vpack.c.bf16 %v548_v36, %v546_v30  ;;  %v553_v45 = vpack.c.bf16 %v549_v37, %v547_v32 }
 0x10b   : > { %v502_v42 = vpop.permute.xlu0 %501  ;;  %v390_v16 = vpop.permute.xlu1 %389 }
 0x10c   : > { %v394_v28 = vsel %vm393_vm5, %v2708_v23, %v390_v16  ;;  %v395_v29 = vsel %vm393_vm5, %v390_v16, %v2708_v23  ;;  %v2447_v16 = vmov 0.0  }
 0x10d   : > { %v398_v40 = vmul.f32 %v396_v59, %v395_v29  ;;  %v399_v41 = vmul.f32 %v397_v4, %v394_v28  ;;  %764 = vst [vmem:[#allocation3] sm:$0xff] %v2447_v16 }
 0x10e   : > { %765 = vst [vmem:[#allocation4] sm:$0xff] %v2447_v16 }
 0x10f   : > { %v542_v50 = vsel %vm541_vm7, %v398_v40, %v514_v38  ;;  %v543_v52 = vsel %vm541_vm7, %v399_v41, %v515_v39 }
 0x113   : > { %v504_v9 = vpop.permute.xlu0 %503  ;;  %v559_v56 = vpop.permute.xlu1 %558 }
 0x114   : > { %v506_v12 = vsel %vm505_vm6, %v502_v42, %v504_v9  ;;  %v507_v13 = vsel %vm505_vm6, %v504_v9, %v502_v42 }
 0x115   : > { %v510_v17 = vmul.f32 %v508_v60, %v506_v12  ;;  %v511_v18 = vmul.f32 %v509_v61, %v507_v13  ;;  %v2774_v13 = vunpack.c.0.s8 %v646_v11 }
 0x117   : > { %v554_v22 = vpack.c.bf16 %v510_v17, %v510_v17  ;;  %v555_v24 = vpack.c.bf16 %v511_v18, %v511_v18 }
 0x119   : > { %v567_v33 = vsel %vm565_vm8, %v554_v22, 0  ;;  %v570_v34 = vsel %vm565_vm8, %v555_v24, 0  ;;  %v2448_v24 = vmov 1934713408  }
 0x11a   : > { %577 = vmatpush.bf16.msra.mxu0 %v567_v33  ;;  %590 = vmatpush.bf16.msra.mxu1 %v570_v34 }
 0x11b   : > { %v424_v23 = vpop.permute.xlu0 %423 }
 0x11c   : > { %v426_v42 = vsel %vm425_vm9, %v422_v35, %v424_v23  ;;  %v427_v43 = vsel %vm425_vm9, %v424_v23, %v422_v35 }
 0x11d   : > { %v430_v48 = vmul.f32 %v428_v26, %v427_v43  ;;  %v431_v49 = vmul.f32 %v429_v27, %v426_v42  ;;  %v672_v26 = vunpack.c.l.s4 %v2448_v24 }
 0x11e   : > { %578 = vmatpush.bf16.msra.mxu0 %v552_v44  ;;  %591 = vmatpush.bf16.msra.mxu1 %v553_v45 }
 0x11f   : > { %v544_v51 = vsel %vm541_vm7, %v430_v48, %v520_v46  ;;  %v545_v53 = vsel %vm541_vm7, %v431_v49, %v521_v47  ;;  %v673_v34 = vunpack.c.0.s8 %v672_v26 }
 0x120   : > { %v550_v54 = vpack.c.bf16 %v544_v51, %v542_v50  ;;  %v551_v55 = vpack.c.bf16 %v545_v53, %v543_v52 }
 0x122   : > { %579 = vmatpush.bf16.msra.mxu0 %v550_v54  ;;  %592 = vmatpush.bf16.msra.mxu1 %v551_v55 }
 0x125   : > { %1933 = vmatmul.msk.bf16.vlgmr.msra.gmra.mxu0 %vm561_vm10, %v379_v31  ;;  %1934 = vmatmul.msk.bf16.vlgmr.msra.gmra.mxu1 %vm561_vm10, %v379_v31 }
 0x1a2   : > { %v581_v57 = vpop.f32.mrf.mxu0  ;;  %v594_v58 = vpop.f32.mrf.mxu1 }
 0x1a3   : > { %v582_v59 = vadd.f32 %v581_v57, %v559_v56  ;;  %v595_v62 = vadd.f32 %v594_v58, %v559_v56 }
 0x1a5   : > { %614 = vrot.lane.b32.xlu1 %v582_v59, %s2441_s7  ;;  %605 = vrot.lane.b32.xlu0 %v582_v59, %s2442_s12 }
 0x1a6   : > { %602 = vrot.lane.b32.xlu2 %v582_v59, %s2443_s18 }
 0x1aa   : > { %v583_v60 = vpop.f32.mrf.mxu0  ;;  %v596_v61 = vpop.f32.mrf.mxu1 }
 0x1ad   : > { %627 = vrot.lane.b32.xlu1 %v595_v62, %s2442_s12  ;;  %624 = vrot.lane.b32.xlu0 %v595_v62, %s2443_s18 }
 0x1ae   : > { %617 = vrot.lane.b32.xlu2 %v582_v59, %s2433_s17 }
 0x1b5   : > { %599 = vrot.lane.b32.xlu1 %v582_v59, %s2437_s24  ;;  %639 = vrot.lane.b32.xlu0 %v595_v62, %s2433_s17 }
 0x1b6   : > { %636 = vrot.lane.b32.xlu2 %v595_v62, %s2441_s7 }
 0x1bd   : > { %621 = vrot.lane.b32.xlu1 %v595_v62, %s2437_s24  ;;  %611 = vrot.lane.b32.xlu0 %v582_v59, %s2444_s20 }
 0x1be   : > { %608 = vrot.lane.b32.xlu2 %v582_v59, %s2445_s21 }
 0x1c5   : > { %633 = vrot.lane.b32.xlu0 %v595_v62, %s2444_s20 }
 0x1c6   : > { %630 = vrot.lane.b32.xlu2 %v595_v62, %s2445_s21 }
 0x200   : > { %v603_v63 = vpop.permute.xlu2 %602 }
 0x201   : > { %v642_v12 = vrot.slane %v603_v63, 4 }
 0x203   : > { %v644_v15 = vsel %vm643_vm11, %v642_v12, %v582_v59 }
 0x204   : > { %v648_v21 = vperm.slane %v644_v15, %v2774_v13 }
 0x206   : > { %v669_v30 = vrot.slane %v648_v21, 4 }
 0x208   : > { %v618_v4 = vpop.permute.xlu2 %617 }
 0x209   : > { %v661_v35 = vrot.slane %v618_v4, 4 }
 0x210   : > { %v637_v7 = vpop.permute.xlu2 %636 }
 0x211   : > { %v711_v23 = vrot.slane %v637_v7, 4 }
 0x217   : > { %v615_v5 = vpop.permute.xlu1 %614  ;;  %v606_v6 = vpop.permute.xlu0 %605 }
 0x218   : > { %v609_v14 = vpop.permute.xlu2 %608  ;;  %v655_v17 = vrot.slane %v615_v5, 4  ;;  %v649_v18 = vrot.slane %v606_v6, 4 }
 0x21a   : > { %v656_v28 = vsel %vm643_vm11, %v655_v17, %v609_v14 }
 0x21b   : > { %v660_v32 = vperm.slane %v656_v28, %v2774_v13 }
 0x21d   : > { %v681_v45 = vrot.slane %v660_v32, 4 }
 0x21f   : > { %v628_v8 = vpop.permute.xlu1 %627  ;;  %v625_v9 = vpop.permute.xlu0 %624 }
 0x220   : > { %v699_v22 = vrot.slane %v625_v9, 4  ;;  %v705_v36 = vrot.slane %v628_v8, 4  ;;  %v631_v37 = vpop.permute.xlu2 %630 }
 0x221   : > { %v712_v49 = vsel %vm643_vm11, %v711_v23, %v631_v37 }
 0x222   : > { %v700_v33 = vsel %vm643_vm11, %v699_v22, %v595_v62  ;;  %v716_v31 = vperm.slane %v712_v49, %v2774_v13 }
 0x223   : > { %v704_v42 = vperm.slane %v700_v33, %v2774_v13 }
 0x224   : > { %v737_v11 = vrot.slane %v716_v31, 4 }
 0x225   : > { %v725_v53 = vrot.slane %v704_v42, 4 }
 0x227   : > { %v600_v19 = vpop.permute.xlu1 %599  ;;  %v640_v20 = vpop.permute.xlu0 %639 }
 0x228   : > { %v650_v25 = vsel %vm643_vm11, %v649_v18, %v600_v19  ;;  %v717_v62 = vrot.slane %v640_v20, 4 }
 0x229   : > { %v654_v27 = vperm.slane %v650_v25, %v2774_v13 }
 0x22b   : > { %v667_v29 = vrot.slane %v654_v27, 4  ;;  %v670_v38 = vsel %vm643_vm11, %v654_v27, %v669_v30 }
 0x22c   : > { %v678_v46 = vperm.slane %v670_v38, %v673_v34 }
 0x22d   : > { %v668_v39 = vsel %vm643_vm11, %v667_v29, %v648_v21 }
 0x22e   : > { %v674_v50 = vperm.slane %v668_v39, %v673_v34  ;;  %v697_v56 = vrot.slane %v678_v46, 4 }
 0x22f   : > { %v622_v40 = vpop.permute.xlu1 %621  ;;  %v612_v41 = vpop.permute.xlu0 %611 }
 0x230   : > { %v706_v43 = vsel %vm643_vm11, %v705_v36, %v622_v40  ;;  %v662_v44 = vsel %vm643_vm11, %v661_v35, %v612_v41  ;;  %v693_v58 = vrot.slane %v674_v50, 4 }
 0x231   : > { %v710_v47 = vperm.slane %v706_v43, %v2774_v13  ;;  %v666_v48 = vperm.slane %v662_v44, %v2774_v13 }
 0x233   : > { %v679_v51 = vrot.slane %v666_v48, 4  ;;  %v682_v52 = vsel %vm643_vm11, %v666_v48, %v681_v45  ;;  %v723_v54 = vrot.slane %v710_v47, 4  ;;  %v726_v59 = vsel %vm643_vm11, %v710_v47, %v725_v53 }
 0x234   : > { %v690_v55 = vperm.slane %v682_v52, %v673_v34  ;;  %v734_v9 = vperm.slane %v726_v59, %v673_v34 }
 0x235   : > { %v680_v57 = vsel %vm643_vm11, %v679_v51, %v660_v32  ;;  %v724_v5 = vsel %vm643_vm11, %v723_v54, %v704_v42 }
 0x236   : > { %v686_v60 = vperm.slane %v680_v57, %v673_v34  ;;  %v695_v61 = vrot.slane %v690_v55, 4  ;;  %v698_v63 = vsel %vm643_vm11, %v690_v55, %v697_v56  ;;  %v730_v15 = vperm.slane %v724_v5, %v673_v34 }
 0x237   : > { %v634_v4 = vpop.permute.xlu0 %633  ;;  %762 = vst.msk [vmem:[#allocation2 + $0x30] sm:$0xff] %vm755_vm12, %v698_v63  ;;  %v753_v18 = vrot.slane %v734_v9, 4 }
 0x238   : > { %v691_v6 = vrot.slane %v686_v60, 4  ;;  %v694_v7 = vsel %vm643_vm11, %v686_v60, %v693_v58  ;;  %v696_v8 = vsel %vm643_vm11, %v695_v61, %v678_v46  ;;  %v718_v10 = vsel %vm643_vm11, %v717_v62, %v634_v4 }
 0x239   : > { %758 = vst.msk [vmem:[#allocation2 + $0x10] sm:$0xff] %vm755_vm12, %v694_v7  ;;  %v722_v14 = vperm.slane %v718_v10, %v2774_v13  ;;  %v749_v21 = vrot.slane %v730_v15, 4 }
 0x23a   : > { %v692_v12 = vsel %vm643_vm11, %v691_v6, %v674_v50  ;;  %760 = vst.msk [vmem:[#allocation2 + $0x20] sm:$0xff] %vm755_vm12, %v696_v8 }
 0x23b   : > { %756 = vst.msk [vmem:[#allocation2] sm:$0xff] %vm755_vm12, %v692_v12  ;;  %v735_v16 = vrot.slane %v722_v14, 4  ;;  %v738_v17 = vsel %vm643_vm11, %v722_v14, %v737_v11 }
 0x23c   : > { %v746_v19 = vperm.slane %v738_v17, %v673_v34 }
 0x23d   : > { %v736_v20 = vsel %vm643_vm11, %v735_v16, %v716_v31 }
 0x23e   : > { %v742_v25 = vperm.slane %v736_v20, %v673_v34  ;;  %v751_v22 = vrot.slane %v746_v19, 4  ;;  %v754_v24 = vsel %vm643_vm11, %v746_v19, %v753_v18 }
 0x23f   : > { %763 = vst.msk [vmem:[#allocation2 + $0x38] sm:$0xff] %vm755_vm12, %v754_v24 }
 0x240   : > { %v747_v26 = vrot.slane %v742_v25, 4  ;;  %v750_v13 = vsel %vm643_vm11, %v742_v25, %v749_v21  ;;  %v752_v27 = vsel %vm643_vm11, %v751_v22, %v734_v9 }
 0x241   : > { %759 = vst.msk [vmem:[#allocation2 + $0x18] sm:$0xff] %vm755_vm12, %v750_v13 }
 0x242   : > { %v748_v28 = vsel %vm643_vm11, %v747_v26, %v730_v15  ;;  %761 = vst.msk [vmem:[#allocation2 + $0x28] sm:$0xff] %vm755_vm12, %v752_v27 }
 0x243   : > { %757 = vst.msk [vmem:[#allocation2 + $0x8] sm:$0xff] %vm755_vm12, %v748_v28 }
 0x244 PF: > { %v766_v29 = vld [vmem:[%s327_s6] sm:$0xff]  ;;  %s2449_s17 = smov 17   ;;  %s2450_s24 = smov 16   ;;  %v779_v55 = vlaneseq  ;;  %v2457_v59 = vmov 0   ;;  %v800_v61 = vperm.slane %v2690_v0, 1  ;;  %v801_v62 = vperm.slane %v2692_v1, 1 }
 0x245   : > { %770 = vst [vmem:[#allocation1] ss:$2 sm:$0xff] %v766_v29  ;;  %s2451_s23 = smov 1   ;;  %s2452_s6 = smov 127   ;;  %2113 = vset.pattern.permute.xlu1 %v2457_v59  ;;  %2172 = vset.pattern.permute.xlu0 %v2457_v59  ;;  %v880_v5 = vperm.slane %v2690_v0, 7  ;;  %v881_v6 = vperm.slane %v2692_v1, 7 }
 0x246   : > { %s2453_s13 = smov 113   ;;  %s2454_s19 = smov 112   ;;  %v2830_v57 = vand.u32 127, %v779_v55  ;;  %v848_v9 = vperm.slane %v2690_v0, 5  ;;  %v849_v10 = vperm.slane %v2692_v1, 5  ;;  %v832_v14 = vperm.slane %v2690_v0, 3 }
 0x247   : > { %s2455_s4 = smov 111   ;;  %s2456_s5 = smov 15   ;;  %v833_v17 = vperm.slane %v2692_v1, 3  ;;  %v864_v25 = vperm.slane %v2690_v0, 6  ;;  %v865_v26 = vperm.slane %v2692_v1, 6  ;;  %v784_v13 = vperm.slane %v2690_v0, 0 }
 0x248   : > { %s3283_s16 = sld [smem:[#allocation27_spill]]  ;;  %vm797_vm13 = vcmp.lt.s32.totalorder %v2830_v57, 16  ;;  %vm877_vm14 = vcmp.lt.s32.totalorder %v2830_v57, 112  ;;  %vm845_vm15 = vcmp.lt.s32.totalorder %v2830_v57, 127  ;;  %vm829_vm0 = vcmp.lt.s32.totalorder %v2830_v57, 1  ;;  %s2458_s18 = smov 96  }
 0x249   : > { %vm861_vm1 = vcmp.lt.s32.totalorder %v2830_v57, 113  ;;  %vm781_vm2 = vcmp.lt.s32.totalorder %v2830_v57, 17  ;;  %vm893_vm3 = vcmp.lt.s32.totalorder %v2830_v57, 111  ;;  %v896_v27 = vperm.slane %v2694_v2, 0  ;;  %s3284_s12 = sld [smem:[#allocation26_spill]]  ;;  %s2459_s20 = smov 80  }
 0x24a   : > { %v897_v28 = vperm.slane %v2696_v3, 0  ;;  %vm929_vm4 = vcmask 1043456   ;;  %vm953_vm5 = vcmask 1041408   ;;  %vm813_vm6 = vcmp.lt.s32.totalorder %v2830_v57, 15  ;;  %s2460_s21 = smov 32  }
 0x24b   : > { %vm949_vm7 = vcmask 293888   ;;  %vm1031_vm8 = vcmask 1047556   ;;  %vm1306_vm9 = vcmask 130048  }
 0x24c   : > { %v771_v30 = vld.sshfl [vmem:[#allocation1] sm:$0xff pattern:$0x75316420]  ;;  %v772_v32 = vld.sshfl [vmem:[#allocation1 + $0x8] sm:$0xff pattern:$0x75316420] }
 0x24d   : > { %788 = vst [vmem:[#allocation1] ss:$2 sm:$0xff] %v766_v29  ;;  %775 = vrot.lane.b32.xlu0 %v771_v30, %s2449_s17 }
 0x24e   : > { %v768_v58 = vld [vmem:[%s3283_s16] sm:$0xf] }
 0x24f   : > { %v767_v57 = vld [vmem:[%s3284_s12] sm:$0x3] }
 0x254   : > { %v789_v33 = vld.sshfl [vmem:[#allocation1] sm:$0xff pattern:$0x75316420]  ;;  %v790_v34 = vld.sshfl [vmem:[#allocation1 + $0x8] sm:$0xff pattern:$0x75316420] }
 0x255   : > { %804 = vst [vmem:[#allocation1] ss:$2 sm:$0xff] %v766_v29  ;;  %795 = vrot.lane.b32.xlu0 %v790_v34, %s2450_s24  ;;  %793 = vrot.lane.b32.xlu2 %v789_v33, %s2450_s24 }
 0x25c   : > { %v805_v35 = vld.sshfl [vmem:[#allocation1] sm:$0xff pattern:$0x75316420]  ;;  %v806_v36 = vld.sshfl [vmem:[#allocation1 + $0x8] sm:$0xff pattern:$0x75316420] }
 0x25d   : > { %820 = vst [vmem:[#allocation1] ss:$2 sm:$0xff] %v766_v29 }
 0x264   : > { %v821_v37 = vld.sshfl [vmem:[#allocation1] sm:$0xff pattern:$0x75316420]  ;;  %v822_v38 = vld.sshfl [vmem:[#allocation1 + $0x8] sm:$0xff pattern:$0x75316420] }
 0x265   : > { %825 = vrot.lane.b32.xlu1 %v821_v37, %s2451_s23  ;;  %836 = vst [vmem:[#allocation1] ss:$2 sm:$0xff] %v766_v29  ;;  %827 = vrot.lane.b32.xlu2 %v822_v38, %s2451_s23  ;;  %s2462_s23 = smov 64  }
 0x26c   : > { %v837_v39 = vld.sshfl [vmem:[#allocation1] sm:$0xff pattern:$0x75316420]  ;;  %v838_v40 = vld.sshfl [vmem:[#allocation1 + $0x8] sm:$0xff pattern:$0x75316420] }
 0x26d   : > { %841 = vrot.lane.b32.xlu1 %v837_v39, %s2452_s6  ;;  %852 = vst [vmem:[#allocation1] ss:$2 sm:$0xff] %v766_v29 }
 0x274   : > { %v854_v41 = vld.sshfl [vmem:[#allocation1 + $0x8] sm:$0xff pattern:$0x75316420]  ;;  %v853_v23 = vld.sshfl [vmem:[#allocation1] sm:$0xff pattern:$0x75316420] }
 0x275   : > { %843 = vrot.lane.b32.xlu1 %v838_v40, %s2452_s6  ;;  %857 = vrot.lane.b32.xlu0 %v853_v23, %s2453_s13  ;;  %868 = vst [vmem:[#allocation1] ss:$2 sm:$0xff] %v766_v29 }
 0x27c   : > { %v869_v42 = vld.sshfl [vmem:[#allocation1] sm:$0xff pattern:$0x75316420]  ;;  %v870_v43 = vld.sshfl [vmem:[#allocation1 + $0x8] sm:$0xff pattern:$0x75316420] }
 0x27d   : > { %859 = vrot.lane.b32.xlu1 %v854_v41, %s2453_s13  ;;  %884 = vst [vmem:[#allocation1] ss:$2 sm:$0xff] %v766_v29  ;;  %873 = vrot.lane.b32.xlu2 %v869_v42, %s2454_s19 }
 0x284   : > { %v885_v44 = vld.sshfl [vmem:[#allocation1] sm:$0xff pattern:$0x75316420]  ;;  %v886_v45 = vld.sshfl [vmem:[#allocation1 + $0x8] sm:$0xff pattern:$0x75316420] }
 0x285   : > { %777 = vrot.lane.b32.xlu1 %v772_v32, %s2449_s17  ;;  %889 = vrot.lane.b32.xlu0 %v885_v44, %s2455_s4  ;;  %912 = vst [vmem:[#allocation1] ss:$2 sm:$0xff] %v766_v29  ;;  %v785_v32 = vperm.slane %v2692_v1, 0  ;;  %s2461_s17 = smov 48  }
 0x286   : > { %875 = vrot.lane.b32.xlu2 %v870_v43, %s2454_s19 }
 0x28c   : > { %v2824_v46 = vld.sshfl [vmem:[#allocation1] sm:$0xff pattern:$0x75316420]  ;;  %v2826_v47 = vld.sshfl [vmem:[#allocation1 + $0x8] sm:$0xff pattern:$0x75316420] }
 0x28d   : > { %891 = vrot.lane.b32.xlu0 %v886_v45, %s2455_s4  ;;  %1749 = vst [vmem:[#allocation1] ss:$2 sm:$0xff] %v766_v29  ;;  %946 = vperm.xlu1 %2113, %v768_v58  }
 0x28e   : > { %809 = vrot.lane.b32.xlu2 %v805_v35, %s2456_s5 }
 0x295   : > { %811 = vrot.lane.b32.xlu0 %v806_v36, %s2456_s5 }
 0x2af   : > { %v794_v48 = vpop.permute.xlu2 %793 }
 0x2bf   : > { %v2828_v50 = vpop.permute.xlu0 %775  ;;  %v828_v51 = vpop.permute.xlu2 %827 }
 0x2c7   : > { %v796_v53 = vpop.permute.xlu0 %795 }
 0x2c8   : > { %v798_v63 = vsel %vm797_vm13, %v794_v48, %v796_v53  ;;  %v799_v4 = vsel %vm797_vm13, %v796_v53, %v794_v48 }
 0x2c9   : > { %v2847_v18 = vmul.f32 %v800_v61, %v799_v4  ;;  %v2849_v19 = vmul.f32 %v801_v62, %v798_v63 }
 0x2cb   : > { %v903_v61 = vrot.slane %v2849_v19, 4 }
 0x2d7   : > { %v826_v49 = vpop.permute.xlu1 %825  ;;  %v874_v54 = vpop.permute.xlu2 %873 }
 0x2d8   : > { %v830_v33 = vsel %vm829_vm0, %v826_v49, %v828_v51  ;;  %v831_v34 = vsel %vm829_vm0, %v828_v51, %v826_v49  ;;  %v816_v49 = vperm.slane %v2690_v0, 2  ;;  %v817_v51 = vperm.slane %v2692_v1, 2 }
 0x2d9   : > { %v834_v44 = vmul.f32 %v832_v14, %v831_v34  ;;  %v835_v45 = vmul.f32 %v833_v17, %v830_v33 }
 0x2df   : > { %v842_v52 = vpop.permute.xlu1 %841 }
 0x2e0   : > { %v876_v60 = vpop.permute.xlu2 %875 }
 0x2e1   : > { %v878_v11 = vsel %vm877_vm14, %v874_v54, %v876_v60  ;;  %v879_v12 = vsel %vm877_vm14, %v876_v60, %v874_v54  ;;  %v902_v60 = vrot.slane %v2847_v18, 4 }
 0x2e2   : > { %v882_v20 = vmul.f32 %v880_v5, %v878_v11  ;;  %v883_v21 = vmul.f32 %v881_v6, %v879_v12  ;;  %v908_v6 = vrot.slane %v834_v44, 4 }
 0x2e4   : > { %v925_v35 = vrot.slane %v882_v20, 4  ;;  %v926_v36 = vrot.slane %v883_v21, 4 }
 0x2e7   : > { %v844_v31 = vpop.permute.xlu1 %843  ;;  %v858_v56 = vpop.permute.xlu0 %857 }
 0x2e8   : > { %v846_v15 = vsel %vm845_vm15, %v842_v52, %v844_v31  ;;  %v847_v16 = vsel %vm845_vm15, %v844_v31, %v842_v52  ;;  %v810_v59 = vpop.permute.xlu2 %809 }
 0x2e9   : > { %v850_v22 = vmul.f32 %v848_v9, %v846_v15  ;;  %v851_v24 = vmul.f32 %v849_v10, %v847_v16 }
 0x2eb   : > { %v919_v38 = vrot.slane %v850_v22, 4  ;;  %v920_v39 = vrot.slane %v851_v24, 4 }
 0x2ed   : > { %v934_v55 = vsel %vm929_vm4, %v2824_v46, %v919_v38  ;;  %v935_v31 = vsel %vm929_vm4, %v2826_v47, %v920_v39 }
 0x2ef   : > { %v860_v7 = vpop.permute.xlu1 %859 }
 0x2f0   : > { %v862_v29 = vsel %vm861_vm1, %v858_v56, %v860_v7  ;;  %v863_v30 = vsel %vm861_vm1, %v860_v7, %v858_v56  ;;  %v909_v7 = vrot.slane %v835_v45, 4 }
 0x2f1   : > { %v866_v41 = vmul.f32 %v864_v25, %v862_v29  ;;  %v867_v3 = vmul.f32 %v865_v26, %v863_v30 }
 0x2f3   : > { %v936_v0 = vsel %vm929_vm4, %v866_v41, %v925_v35  ;;  %v937_v1 = vsel %vm929_vm4, %v867_v3, %v926_v36 }
 0x2f4   : > { %v940_v4 = vpack.c.bf16 %v936_v0, %v934_v55  ;;  %v941_v5 = vpack.c.bf16 %v937_v1, %v935_v31 }
 0x2f7   : > { %v890_v8 = vpop.permute.xlu0 %889  ;;  %v778_v23 = vpop.permute.xlu1 %777 }
 0x2f8   : > { %v782_v53 = vsel %vm781_vm2, %v2828_v50, %v778_v23  ;;  %v783_v54 = vsel %vm781_vm2, %v778_v23, %v2828_v50 }
 0x2f9   : > { %v786_v50 = vmul.f32 %v784_v13, %v783_v54  ;;  %v787_v62 = vmul.f32 %v785_v32, %v782_v53  ;;  %v2463_v13 = vmov 1983009808  }
 0x2fb   : > { %v930_v10 = vsel %vm929_vm4, %v786_v50, %v902_v60  ;;  %v931_v12 = vsel %vm929_vm4, %v787_v62, %v903_v61 }
 0x2ff   : > { %v892_v37 = vpop.permute.xlu0 %891  ;;  %v947_v17 = vpop.permute.xlu1 %946 }
 0x300   : > { %v894_v40 = vsel %vm893_vm3, %v890_v8, %v892_v37  ;;  %v895_v2 = vsel %vm893_vm3, %v892_v37, %v890_v8 }
 0x301   : > { %v898_v42 = vmul.f32 %v896_v27, %v894_v40  ;;  %v899_v43 = vmul.f32 %v897_v28, %v895_v2  ;;  %v1034_v27 = vunpack.c.l.s4 %v2463_v13 }
 0x303   : > { %v942_v48 = vpack.c.bf16 %v898_v42, %v898_v42  ;;  %v943_v52 = vpack.c.bf16 %v899_v43, %v899_v43  ;;  %v2900_v29 = vunpack.c.0.s8 %v1034_v27 }
 0x305   : > { %v955_v56 = vsel %vm953_vm5, %v942_v48, 0  ;;  %v958_v58 = vsel %vm953_vm5, %v943_v52, 0  ;;  %v2464_v48 = vmov 1934713408  }
 0x306   : > { %965 = vmatpush.bf16.msra.mxu0 %v955_v56  ;;  %978 = vmatpush.bf16.msra.mxu1 %v958_v58  ;;  %v1060_v52 = vunpack.c.l.s4 %v2464_v48 }
 0x307   : > { %v812_v63 = vpop.permute.xlu0 %811 }
 0x308   : > { %v814_v46 = vsel %vm813_vm6, %v810_v59, %v812_v63  ;;  %v815_v47 = vsel %vm813_vm6, %v812_v63, %v810_v59  ;;  %v2909_v61 = vunpack.c.0.s8 %v1060_v52 }
 0x309   : > { %v818_v8 = vmul.f32 %v816_v49, %v815_v47  ;;  %v819_v9 = vmul.f32 %v817_v51, %v814_v46 }
 0x30a   : > { %966 = vmatpush.bf16.msra.mxu0 %v940_v4  ;;  %979 = vmatpush.bf16.msra.mxu1 %v941_v5 }
 0x30b   : > { %v932_v11 = vsel %vm929_vm4, %v818_v8, %v908_v6  ;;  %v933_v14 = vsel %vm929_vm4, %v819_v9, %v909_v7 }
 0x30c   : > { %v938_v15 = vpack.c.bf16 %v932_v11, %v930_v10  ;;  %v939_v16 = vpack.c.bf16 %v933_v14, %v931_v12 }
 0x30e   : > { %967 = vmatpush.bf16.msra.mxu0 %v938_v15  ;;  %980 = vmatpush.bf16.msra.mxu1 %v939_v16 }
 0x311   : > { %1935 = vmatmul.msk.bf16.vlgmr.msra.gmra.mxu0 %vm949_vm7, %v767_v57  ;;  %1936 = vmatmul.msk.bf16.vlgmr.msra.gmra.mxu1 %vm949_vm7, %v767_v57 }
 0x38e   : > { %v969_v18 = vpop.f32.mrf.mxu0  ;;  %v982_v19 = vpop.f32.mrf.mxu1 }
 0x38f   : > { %v970_v20 = vadd.f32 %v969_v18, %v947_v17  ;;  %v983_v21 = vadd.f32 %v982_v19, %v947_v17 }
 0x391   : > { %v2124_v25 = vpack.i.bf16 %v983_v21, %v970_v20 }
 0x393   : > { %2125 = vrot.lane.b32.xlu1 %v2124_v25, %s2458_s18  ;;  %2120 = vrot.lane.b32.xlu0 %v2124_v25, %s2454_s19 }
 0x394   : > { %2115 = vrot.lane.b32.xlu2 %v2124_v25, %s2459_s20 }
 0x396   : > { %v971_v22 = vpop.f32.mrf.mxu0  ;;  %v984_v24 = vpop.f32.mrf.mxu1 }
 0x39b   : > { %2140 = vrot.lane.b32.xlu1 %v2124_v25, %s2460_s21  ;;  %2135 = vrot.lane.b32.xlu0 %v2124_v25, %s2461_s17 }
 0x39c   : > { %2130 = vrot.lane.b32.xlu2 %v2124_v25, %s2450_s24 }
 0x3a3   : > { %1018 = vrot.lane.b32.xlu0 %v983_v21, %s2462_s23 }
 0x3a4   : > { %996 = vrot.lane.b32.xlu2 %v970_v20, %s2462_s23 }
 0x3ee   : > { %v2116_v26 = vpop.permute.xlu2 %2115 }
 0x3ef   : > { %v2117_v28 = vunpack.i.l.bf16 %v2116_v26  ;;  %v2118_v33 = vunpack.i.h.bf16 %v2116_v26 }
 0x3f1   : > { %v1037_v34 = vrot.slane %v2117_v28, 4  ;;  %v1093_v42 = vrot.slane %v2118_v33, 4 }
 0x3f6   : > { %v2131_v35 = vpop.permute.xlu2 %2130 }
 0x3f7   : > { %v2133_v41 = vunpack.i.h.bf16 %v2131_v35  ;;  %v2132_v3 = vunpack.i.l.bf16 %v2131_v35 }
 0x3f9   : > { %v1105_v51 = vrot.slane %v2133_v41, 4  ;;  %v1049_v53 = vrot.slane %v2132_v3, 4 }
 0x3fe   : > { %v997_v47 = vpop.permute.xlu2 %996 }
 0x405   : > { %v2126_v30 = vpop.permute.xlu1 %2125  ;;  %v2121_v32 = vpop.permute.xlu0 %2120 }
 0x406   : > { %v2127_v36 = vunpack.i.l.bf16 %v2126_v30  ;;  %v2122_v37 = vunpack.i.l.bf16 %v2121_v32  ;;  %v2128_v38 = vunpack.i.h.bf16 %v2126_v30  ;;  %v2123_v40 = vunpack.i.h.bf16 %v2121_v32 }
 0x408   : > { %v1030_v39 = vrot.slane %v2127_v36, 4  ;;  %v1038_v2 = vsel %vm1031_vm8, %v1037_v34, %v2122_v37  ;;  %v1087_v44 = vrot.slane %v2128_v38, 4  ;;  %v1094_v49 = vsel %vm1031_vm8, %v1093_v42, %v2123_v40 }
 0x409   : > { %v1042_v23 = vperm.slane %v1038_v2, %v2900_v29  ;;  %v1098_v60 = vperm.slane %v1094_v49, %v2900_v29 }
 0x40a   : > { %v1032_v43 = vsel %vm1031_vm8, %v1030_v39, %v970_v20  ;;  %v1088_v1 = vsel %vm1031_vm8, %v1087_v44, %v983_v21 }
 0x40b   : > { %v1036_v45 = vperm.slane %v1032_v43, %v2900_v29  ;;  %v1055_v54 = vrot.slane %v1042_v23, 4  ;;  %v1092_v8 = vperm.slane %v1088_v1, %v2900_v29  ;;  %v1111_v12 = vrot.slane %v1098_v60, 4 }
 0x40d   : > { %v2141_v55 = vpop.permute.xlu1 %2140  ;;  %v2136_v31 = vpop.permute.xlu0 %2135  ;;  %v1057_v56 = vrot.slane %v1036_v45, 4  ;;  %v1056_v5 = vsel %vm1031_vm8, %v1055_v54, %v1036_v45  ;;  %v1113_v21 = vrot.slane %v1092_v8, 4  ;;  %v1112_v26 = vsel %vm1031_vm8, %v1111_v12, %v1092_v8  ;;  %v1284_v8 = vld [vmem:[#allocation2 + $0x28] sm:$0xff]  ;;  %v1286_v12 = vld [vmem:[#allocation2 + $0x38] sm:$0xff] }
 0x40e   : > { %v2142_v58 = vunpack.i.l.bf16 %v2141_v55  ;;  %v2138_v59 = vunpack.i.h.bf16 %v2136_v31  ;;  %v2137_v0 = vunpack.i.l.bf16 %v2136_v31  ;;  %v2143_v50 = vunpack.i.h.bf16 %v2141_v55 }
 0x40f   : > { %v1058_v7 = vsel %vm1031_vm8, %v1042_v23, %v1057_v56  ;;  %v1062_v15 = vperm.slane %v1056_v5, %v2909_v61  ;;  %v1118_v40 = vperm.slane %v1112_v26, %v2909_v61  ;;  %v1114_v2 = vsel %vm1031_vm8, %v1098_v60, %v1113_v21  ;;  %v1279_v56 = vld [vmem:[#allocation2] sm:$0xff]  ;;  %v1282_v60 = vld [vmem:[#allocation2 + $0x18] sm:$0xff] }
 0x410   : > { %v1043_v62 = vrot.slane %v2142_v58, 4  ;;  %v1050_v63 = vsel %vm1031_vm8, %v1049_v53, %v2137_v0  ;;  %v1106_v46 = vsel %vm1031_vm8, %v1105_v51, %v2138_v59  ;;  %v1099_v14 = vrot.slane %v2143_v50, 4  ;;  %v1280_v58 = vld [vmem:[#allocation2 + $0x8] sm:$0xff]  ;;  %v1281_v59 = vld [vmem:[#allocation2 + $0x10] sm:$0xff] }
 0x411   : > { %v1054_v4 = vperm.slane %v1050_v63, %v2900_v29  ;;  %v1110_v11 = vperm.slane %v1106_v46, %v2900_v29  ;;  %v1066_v18 = vperm.slane %v1058_v7, %v2909_v61  ;;  %v1081_v27 = vrot.slane %v1062_v15, 4  ;;  %v1283_v7 = vld [vmem:[#allocation2 + $0x20] sm:$0xff] }
 0x412   : > { %v1044_v6 = vsel %vm1031_vm8, %v1043_v62, %v997_v47  ;;  %v1122_v44 = vperm.slane %v1114_v2, %v2909_v61  ;;  %v1137_v52 = vrot.slane %v1118_v40, 4  ;;  %v1287_v0 = vpack.c.bf16 %v1279_v56, %v1279_v56 }
 0x413   : > { %v1048_v9 = vperm.slane %v1044_v6, %v2900_v29  ;;  %v1067_v10 = vrot.slane %v1054_v4, 4  ;;  %v1123_v25 = vrot.slane %v1110_v11, 4  ;;  %v1085_v33 = vrot.slane %v1066_v18, 4 }
 0x414   : > { %v1141_v53 = vrot.slane %v1122_v44, 4  ;;  %v1288_v1 = vpack.c.bf16 %v1280_v58, %v1280_v58  ;;  %v1289_v50 = vpack.c.bf16 %v1281_v59, %v1281_v59  ;;  %v1290_v62 = vpack.c.bf16 %v1282_v60, %v1282_v60 }
 0x415   : > { %v1069_v16 = vrot.slane %v1048_v9, 4  ;;  %v1019_v57 = vpop.permute.xlu0 %1018  ;;  %v1068_v17 = vsel %vm1031_vm8, %v1067_v10, %v1048_v9  ;;  %v1302_v63 = vunpack.c.l.b16 %v1287_v0  ;;  %v1285_v9 = vld [vmem:[#allocation2 + $0x30] sm:$0xff]  ;;  %v1291_v10 = vpack.c.bf16 %v1283_v7, %v1283_v7 }
 0x416   : > { %v1100_v19 = vsel %vm1031_vm8, %v1099_v14, %v1019_v57  ;;  %v1074_v20 = vperm.slane %v1068_v17, %v2909_v61  ;;  %v1303_v46 = vunpack.c.l.b16 %v1288_v1  ;;  %v1331_v47 = vunpack.c.l.b16 %v1289_v50 }
 0x417   : > { %v1104_v22 = vperm.slane %v1100_v19, %v2900_v29  ;;  %v1070_v24 = vsel %vm1031_vm8, %v1054_v4, %v1069_v16  ;;  %v1332_v4 = vunpack.c.l.b16 %v1290_v62  ;;  %v1293_v14 = vpack.c.bf16 %v1285_v9, %v1285_v9 }
 0x418   : > { %v1079_v13 = vrot.slane %v1074_v20, 4  ;;  %v1078_v28 = vperm.slane %v1070_v24, %v2909_v61  ;;  %v1082_v36 = vsel %vm1031_vm8, %v1074_v20, %v1081_v27  ;;  %v1304_v5 = vpack.c.b16 %v1303_v46, %v1302_v63 }
 0x419   : > { %v1124_v30 = vsel %vm1031_vm8, %v1123_v25, %v1104_v22  ;;  %v1125_v32 = vrot.slane %v1104_v22, 4  ;;  %v1333_v6 = vpack.c.b16 %v1332_v4, %v1331_v47  ;;  %v1359_v16 = vunpack.c.l.b16 %v1291_v10 }
 0x41a   : > { %v1130_v34 = vperm.slane %v1124_v30, %v2909_v61  ;;  %v1080_v35 = vsel %vm1031_vm8, %v1079_v13, %v1062_v15  ;;  %v1083_v37 = vrot.slane %v1078_v28, 4  ;;  %v1086_v23 = vsel %vm1031_vm8, %v1078_v28, %v1085_v33  ;;  %1317 = vmatpush.bf16.msra.mxu2 %v1304_v5 }
 0x41b   : > { %v1126_v38 = vsel %vm1031_vm8, %v1110_v11, %v1125_v32  ;;  %v2144_v39 = vpack.i.bf16 %v1080_v35, %v1082_v36  ;;  %1345 = vmatpush.bf16.msra.mxu3 %v1333_v6  ;;  %v1292_v11 = vpack.c.bf16 %v1284_v8, %v1284_v8  ;;  %v1294_v15 = vpack.c.bf16 %v1286_v12, %v1286_v12 }
 0x41c   : > { %v1135_v41 = vrot.slane %v1130_v34, 4  ;;  %v1084_v3 = vsel %vm1031_vm8, %v1083_v37, %v1066_v18  ;;  %v1134_v42 = vperm.slane %v1126_v38, %v2909_v61  ;;  %v1138_v49 = vsel %vm1031_vm8, %v1130_v34, %v1137_v52 }
 0x41d   : > { %2145 = vxpose.xlu1.b32.start [1/2] (short) (narrow) %v2144_v39, 16  ;;  %v2158_v43 = vpack.i.bf16 %v1084_v3, %v1086_v23  ;;  %v1360_v57 = vunpack.c.l.b16 %v1292_v11  ;;  %v1387_v17 = vunpack.c.l.b16 %v1293_v14  ;;  %v1388_v18 = vunpack.c.l.b16 %v1294_v15 }
 0x41e   : > { %v1139_v45 = vrot.slane %v1134_v42, 4  ;;  %v1136_v48 = vsel %vm1031_vm8, %v1135_v41, %v1118_v40  ;;  %v1142_v55 = vsel %vm1031_vm8, %v1134_v42, %v1141_v53 }
 0x41f   : > { %2159 = vxpose.xlu2.b32.start [1/2] (short) (narrow) %v2158_v43, 16  ;;  %v2146_v54 = vpack.i.bf16 %v1136_v48, %v1138_v49  ;;  %v1361_v19 = vpack.c.b16 %v1360_v57, %v1359_v16  ;;  %v1389_v21 = vpack.c.b16 %v1388_v18, %v1387_v17 }
 0x420   : > { %v1140_v51 = vsel %vm1031_vm8, %v1139_v45, %v1122_v44 }
 0x421   : > { %v2160_v31 = vpack.i.bf16 %v1140_v51, %v1142_v55  ;;  %1373 = vmatpush.bf16.msrb.mxu2 %v1361_v19  ;;  %1401 = vmatpush.bf16.msrb.mxu3 %v1389_v21 }
 0x425   : > { %2147 = vxpose.xlu1.b32.end [2/2] (short) (narrow) %v2146_v54, 16 }
 0x427   : > { %2161 = vxpose.xlu2.b32.end [2/2] (short) (narrow) %v2160_v31, 16 }
 0x4b8   : > { %v2162_v20 = vpop.trf.xlu2 }
 0x4b9   : > { %v2166_v2 = vunpack.i.h.bf16 %v2162_v20  ;;  %v2163_v41 = vunpack.i.l.bf16 %v2162_v20 }
 0x4bb   : > { %v1275_v42 = vpack.c.bf16 %v2166_v2, %v2166_v2  ;;  %v1277_v43 = vpack.c.bf16 %v2163_v41, %v2163_v41 }
 0x4bd   : > { %v1354_v48 = vunpack.c.l.b16 %v1275_v42  ;;  %v1382_v52 = vunpack.c.l.b16 %v1277_v43 }
 0x4c0   : > { %v2167_v25 = vpop.trf.xlu2 }
 0x4c1   : > { %v2148_v22 = vpop.trf.xlu1  ;;  %v2171_v3 = vunpack.i.h.bf16 %v2167_v25  ;;  %v2168_v23 = vunpack.i.l.bf16 %v2167_v25 }
 0x4c2   : > { %v2152_v24 = vunpack.i.h.bf16 %v2148_v22  ;;  %v2149_v26 = vunpack.i.l.bf16 %v2148_v22 }
 0x4c3   : > { %v1276_v44 = vpack.c.bf16 %v2171_v3, %v2171_v3  ;;  %v1278_v45 = vpack.c.bf16 %v2168_v23, %v2168_v23 }
 0x4c4   : > { %v1271_v13 = vpack.c.bf16 %v2152_v24, %v2152_v24  ;;  %v1273_v27 = vpack.c.bf16 %v2149_v26, %v2149_v26 }
 0x4c5   : > { %v1355_v49 = vunpack.c.l.b16 %v1276_v44  ;;  %v1383_v51 = vunpack.c.l.b16 %v1278_v45 }
 0x4c6   : > { %v1297_v35 = vunpack.c.l.b16 %v1271_v13  ;;  %v1326_v37 = vunpack.c.l.b16 %v1273_v27 }
 0x4c7   : > { %v1356_v53 = vpack.c.b16 %v1355_v49, %v1354_v48  ;;  %v1384_v54 = vpack.c.b16 %v1383_v51, %v1382_v52 }
 0x4c9   : > { %v2153_v28 = vpop.trf.xlu1 }
 0x4ca   : > { %v2157_v30 = vunpack.i.h.bf16 %v2153_v28  ;;  %v2154_v32 = vunpack.i.l.bf16 %v2153_v28 }
 0x4cc   : > { %v1272_v33 = vpack.c.bf16 %v2157_v30, %v2157_v30  ;;  %v1274_v34 = vpack.c.bf16 %v2154_v32, %v2154_v32 }
 0x4ce   : > { %v1298_v36 = vunpack.c.l.b16 %v1272_v33  ;;  %v1327_v38 = vunpack.c.l.b16 %v1274_v34 }
 0x4d0   : > { %v1299_v39 = vpack.c.b16 %v1298_v36, %v1297_v35  ;;  %v1328_v40 = vpack.c.b16 %v1327_v38, %v1326_v37 }
 0x4d2   : > { %1937 = vmatmul.msk.bf16.vlgmr.msra.gmra.mxu2 %vm1306_vm9, %v1299_v39  ;;  %1938 = vmatmul.msk.bf16.vlgmr.msra.gmra.mxu3 %vm1306_vm9, %v1328_v40 }
 0x4e2   : > { %1939 = vmatmul.msk.bf16.vlgmr.msrb.gmra.mxu2 %vm1306_vm9, %v1356_v53  ;;  %1940 = vmatmul.msk.bf16.vlgmr.msrb.gmra.mxu3 %vm1306_vm9, %v1384_v54 }
 0x555   : > { %v1319_v55 = vpop.f32.mrf.mxu2  ;;  %v1347_v31 = vpop.f32.mrf.mxu3 }
 0x556   : > { %v1941_v56 = vmul.f32 -1.442695, %v1319_v55  ;;  %v1943_v58 = vmul.f32 -1.442695, %v1347_v31 }
 0x558   : > { %2173 = vpow2.f32 %v1941_v56 }
 0x559   : > { %2175 = vpow2.f32 %v1943_v58 }
 0x55d   : > { %v1321_v59 = vpop.f32.mrf.mxu2  ;;  %v1349_v0 = vpop.f32.mrf.mxu3 }
 0x55e   : > { %v2174_v1 = vpop.eup %2173  ;;  %v1942_v60 = vmul.f32 -1.442695, %v1321_v59  ;;  %v1944_v63 = vmul.f32 -1.442695, %v1349_v0 }
 0x55f   : > { %v2176_v50 = vpop.eup %2175  ;;  %v1432_v62 = vadd.f32 1.0, %v2174_v1 }
 0x560   : > { %v2948_v46 = vadd.f32 1.0, %v2176_v50  ;;  %2177 = vpow2.f32 %v1942_v60 }
 0x561   : > { %2179 = vrcp.f32 %v1432_v62  ;;  %vm1445_vm10 = vweird.f32 %v1432_v62  ;;  %v1449_v24 = vand.u32 2147483647, %v1432_v62  ;;  %v1451_v26 = vand.u32 2147483648, %v1432_v62 }
 0x562   : > { %2181 = vrcp.f32 %v2948_v46  ;;  %vm1475_vm11 = vweird.f32 %v2948_v46  ;;  %v1479_v28 = vand.u32 2147483647, %v2948_v46  ;;  %v1481_v33 = vand.u32 2147483648, %v2948_v46 }
 0x563   : > { %2183 = vpow2.f32 %v1944_v63  ;;  %vm2988_vm14 = vcmp.eq.f32.partialorder %v1449_v24, 8.507059e+37  ;;  %v1452_v3 = vor.u32 1.1754944e-38, %v1451_v26 }
 0x564   : > { %vm3001_vm0 = vcmp.eq.f32.partialorder %v1479_v28, 8.507059e+37  ;;  %v1482_v44 = vor.u32 1.1754944e-38, %v1481_v33 }
 0x565   : > { %v1375_v47 = vpop.f32.mrf.mxu2  ;;  %v1403_v4 = vpop.f32.mrf.mxu3 }
 0x566   : > { %v2178_v5 = vpop.eup %2177  ;;  %v1945_v6 = vmul.f32 -1.442695, %v1375_v47  ;;  %v1947_v9 = vmul.f32 -1.442695, %v1403_v4 }
 0x567   : > { %v2951_v7 = vpop.eup %2179  ;;  %v2953_v8 = vadd.f32 1.0, %v2178_v5 }
 0x568   : > { %v2955_v10 = vpop.eup %2181  ;;  %v1441_v11 = vmul.f32 %v2951_v7, %v1432_v62  ;;  %2185 = vpow2.f32 %v1945_v6  ;;  %vm1446_vm12 = vweird.f32 %v2951_v7 }
 0x569   : > { %v2184_v12 = vpop.eup %2183  ;;  %v1471_v14 = vmul.f32 %v2955_v10, %v2948_v46  ;;  %2187 = vrcp.f32 %v2953_v8  ;;  %v1466_v34 = vand.u32 2147483648, %v2953_v8  ;;  %vm1476_vm13 = vweird.f32 %v2955_v10  ;;  %vm2997_vm15 = vmor %vm1445_vm10, %vm1446_vm12 }
 0x56a   : > { %v1442_v15 = vsub.f32 1.0, %v1441_v11  ;;  %v2961_v16 = vadd.f32 1.0, %v2184_v12  ;;  %2189 = vpow2.f32 %v1947_v9  ;;  %v1464_v23 = vand.u32 2147483647, %v2953_v8  ;;  %vm3008_vm2 = vmor %vm1475_vm11, %vm1476_vm13 }
 0x56b   : > { %v1472_v57 = vsub.f32 1.0, %v1471_v14  ;;  %vm1460_vm1 = vweird.f32 %v2953_v8  ;;  %v1467_v51 = vor.u32 1.1754944e-38, %v1466_v34 }
 0x56c   : > { %2191 = vrcp.f32 %v2961_v16  ;;  %v1443_v20 = vmul.f32 %v2951_v7, %v1442_v15  ;;  %v1496_v2 = vand.u32 2147483648, %v2961_v16  ;;  %v1494_v53 = vand.u32 2147483647, %v2961_v16 }
 0x56d   : > { %v1377_v17 = vpop.f32.mrf.mxu2  ;;  %v1405_v18 = vpop.f32.mrf.mxu3  ;;  %v1473_v13 = vmul.f32 %v2955_v10, %v1472_v57  ;;  %vm1490_vm3 = vweird.f32 %v2961_v16  ;;  %vm3027_vm6 = vcmp.eq.f32.partialorder %v1464_v23, 8.507059e+37 }
 0x56e   : > { %v2186_v19 = vpop.eup %2185  ;;  %v1946_v21 = vmul.f32 -1.442695, %v1377_v17  ;;  %v1948_v25 = vmul.f32 -1.442695, %v1405_v18  ;;  %v1444_v36 = vadd.f32 %v2951_v7, %v1443_v20  ;;  %v3021_v56 = vor.u32 1.1754944e-38, %v1496_v2 }
 0x56f   : > { %v2965_v22 = vpop.eup %2187  ;;  %v2968_v27 = vadd.f32 1.0, %v2186_v19  ;;  %v1474_v39 = vadd.f32 %v2955_v10, %v1473_v13 }
 0x570   : > { %v1456_v30 = vmul.f32 %v2965_v22, %v2953_v8  ;;  %2193 = vpow2.f32 %v1946_v21  ;;  %v2190_v32 = vpop.eup %2189  ;;  %v1448_v54 = vsel %vm2997_vm15, %v2951_v7, %v1444_v36  ;;  %vm1461_vm5 = vweird.f32 %v2965_v22 }
 0x571   : > { %2195 = vrcp.f32 %v2968_v27  ;;  %v2981_v38 = vadd.f32 1.0, %v2190_v32  ;;  %v1478_v31 = vsel %vm3008_vm2, %v2955_v10, %v1474_v39  ;;  %v1511_v58 = vand.u32 2147483648, %v2968_v27  ;;  %vm3053_vm13 = vmor %vm1460_vm1, %vm1461_vm5 }
 0x572   : > { %v2978_v35 = vpop.eup %2191  ;;  %v1457_v37 = vsub.f32 1.0, %v1456_v30  ;;  %2197 = vpow2.f32 %v1948_v25  ;;  %vm1505_vm7 = vweird.f32 %v2968_v27  ;;  %v1509_v50 = vand.u32 2147483647, %v2968_v27 }
 0x573   : > { %v1486_v40 = vmul.f32 %v2978_v35, %v2961_v16  ;;  %2199 = vrcp.f32 %v2981_v38  ;;  %vm1491_vm10 = vweird.f32 %v2978_v35  ;;  %v1453_v63 = vsel %vm2988_vm14, %v1452_v3, %v1448_v54 }
 0x574   : > { %v1458_v49 = vmul.f32 %v2965_v22, %v1457_v37  ;;  %v1483_v6 = vsel %vm3001_vm0, %v1482_v44, %v1478_v31  ;;  %v1512_v7 = vor.u32 1.1754944e-38, %v1511_v58  ;;  %vm1535_vm11 = vweird.f32 %v2981_v38  ;;  %vm3081_vm5 = vmor %vm1490_vm3, %vm1491_vm10 }
 0x575   : > { %v1487_v45 = vsub.f32 1.0, %v1486_v40  ;;  %v1539_v10 = vand.u32 2147483647, %v2981_v38  ;;  %v1541_v12 = vand.u32 2147483648, %v2981_v38  ;;  %vm3058_vm14 = vcmp.eq.f32.partialorder %v1494_v53, 8.507059e+37 }
 0x576   : > { %v2194_v48 = vpop.eup %2193  ;;  %v1459_v47 = vadd.f32 %v2965_v22, %v1458_v49  ;;  %vm3062_vm15 = vcmp.eq.f32.partialorder %v1509_v50, 8.507059e+37  ;;  %v1562_v19 = vrot.slane %v1453_v63, 4  ;;  %v1574_v28 = vrot.slane %v1483_v6, 4 }
 0x577   : > { %v2196_v55 = vpop.eup %2195  ;;  %v3024_v59 = vadd.f32 1.0, %v2194_v48  ;;  %v1488_v62 = vmul.f32 %v2978_v35, %v1487_v45  ;;  %vm3073_vm2 = vcmp.eq.f32.partialorder %v1539_v10, 8.507059e+37 }
 0x578   : > { %v2198_v0 = vpop.eup %2197  ;;  %v1501_v60 = vmul.f32 %v2196_v55, %v2968_v27  ;;  %vm1506_vm12 = vweird.f32 %v2196_v55  ;;  %v1463_v25 = vsel %vm3053_vm13, %v2965_v22, %v1459_v47  ;;  %v1542_v22 = vor.u32 1.1754944e-38, %v1541_v12 }
 0x579   : > { %2201 = vrcp.f32 %v3024_v59  ;;  %v2200_v46 = vpop.eup %2199  ;;  %v3040_v5 = vadd.f32 1.0, %v2198_v0  ;;  %v1489_v15 = vadd.f32 %v2978_v35, %v1488_v62  ;;  %v1524_v20 = vand.u32 2147483647, %v3024_v59  ;;  %vm1507_vm0 = vmor %vm1505_vm7, %vm1506_vm12 }
 0x57a   : > { %v1502_v4 = vsub.f32 1.0, %v1501_v60  ;;  %v1531_v9 = vmul.f32 %v2200_v46, %v2981_v38  ;;  %v1526_v8 = vand.u32 2147483648, %v3024_v59  ;;  %vm1536_vm1 = vweird.f32 %v2200_v46 }
 0x57b   : > { %2203 = vrcp.f32 %v3040_v5  ;;  %vm1520_vm7 = vweird.f32 %v3024_v59  ;;  %v1493_v33 = vsel %vm3081_vm5, %v2978_v35, %v1489_v15  ;;  %v3094_v16 = vsel %vm3027_vm6, %v1467_v51, %v1463_v25  ;;  %vm1537_vm3 = vmor %vm1535_vm11, %vm1536_vm1 }
 0x57c   : > { %v1503_v11 = vmul.f32 %v2196_v55, %v1502_v4  ;;  %v1532_v17 = vsub.f32 1.0, %v1531_v9  ;;  %v1527_v40 = vor.u32 1.1754944e-38, %v1526_v8  ;;  %vm3098_vm10 = vcmp.eq.f32.partialorder %v1524_v20, 8.507059e+37 }
 0x57d   : > { %v1554_v3 = vand.u32 2147483647, %v3040_v5  ;;  %v1556_v53 = vand.u32 2147483648, %v3040_v5  ;;  %vm1550_vm13 = vweird.f32 %v3040_v5  ;;  %vm1731_vm1 = vcmask 392192  }
 0x57e   : > { %v1504_v21 = vadd.f32 %v2196_v55, %v1503_v11  ;;  %v1533_v26 = vmul.f32 %v2200_v46, %v1532_v17  ;;  %vm1739_vm5 = vcmask 916480  }
 0x57f   : > { %v2202_v24 = vpop.eup %2201  ;;  %v1557_v47 = vor.u32 1.1754944e-38, %v1556_v53 }
 0x580   : > { %v1516_v32 = vmul.f32 %v2202_v24, %v3024_v59  ;;  %v1508_v27 = vsel %vm1507_vm0, %v2196_v55, %v1504_v21  ;;  %v1534_v34 = vadd.f32 %v2200_v46, %v1533_v26  ;;  %vm1521_vm12 = vweird.f32 %v2202_v24 }
 0x581   : > { %v1513_v36 = vsel %vm3062_vm15, %v1512_v7, %v1508_v27  ;;  %v2204_v37 = vpop.eup %2203  ;;  %v1498_v55 = vsel %vm3058_vm14, %v3021_v56, %v1493_v33  ;;  %vm3118_vm6 = vmor %vm1520_vm7, %vm1521_vm12  ;;  %v1618_v59 = vrot.slane %v3094_v16, 4  ;;  %vm1555_vm15 = vcmp.eq.f32.partialorder %v1554_v3, 8.507059e+37 }
 0x582   : > { %v1517_v39 = vsub.f32 1.0, %v1516_v32  ;;  %v1560_v2 = vrot.slane %v1513_v36, 4  ;;  %v1546_v35 = vmul.f32 %v2204_v37, %v3040_v5  ;;  %v1538_v23 = vsel %vm1537_vm3, %v2200_v46, %v1534_v34 }
 0x583   : > { %v1543_v43 = vsel %vm3073_vm2, %v1542_v22, %v1538_v23  ;;  %v1563_v38 = vsel %vm1031_vm8, %v1513_v36, %v1562_v19  ;;  %vm1551_vm11 = vweird.f32 %v2204_v37  ;;  %v1630_v46 = vrot.slane %v1498_v55, 4 }
 0x584   : > { %v1518_v42 = vmul.f32 %v2202_v24, %v1517_v39  ;;  %v1561_v44 = vsel %vm1031_vm8, %v1560_v2, %v1453_v63  ;;  %v1547_v45 = vsub.f32 1.0, %v1546_v35  ;;  %v1575_v48 = vsel %vm1031_vm8, %v1543_v43, %v1574_v28  ;;  %vm1552_vm14 = vmor %vm1550_vm13, %vm1551_vm11 }
 0x585   : > { %v1567_v52 = vperm.slane %v1561_v44, %v2900_v29  ;;  %v1572_v49 = vrot.slane %v1543_v43, 4  ;;  %v1583_v54 = vperm.slane %v1575_v48, %v2900_v29  ;;  %v1571_v60 = vperm.slane %v1563_v38, %v2900_v29 }
 0x586   : > { %v1519_v51 = vadd.f32 %v2202_v24, %v1518_v42  ;;  %v1548_v58 = vmul.f32 %v2204_v37, %v1547_v45  ;;  %vm1729_vm0 = vcmask 261120   ;;  %vm1735_vm2 = vcmask 654336  }
 0x587   : > { %v1573_v0 = vsel %vm1031_vm8, %v1572_v49, %v1483_v6  ;;  %v1586_v1 = vrot.slane %v1567_v52, 4  ;;  %v1596_v50 = vrot.slane %v1583_v54, 4  ;;  %v1598_v22 = vrot.slane %v1571_v60, 4 }
 0x588   : > { %v1579_v62 = vperm.slane %v1573_v0, %v2900_v29  ;;  %v1523_v56 = vsel %vm3118_vm6, %v2202_v24, %v1519_v51  ;;  %v1549_v63 = vadd.f32 %v2204_v37, %v1548_v58  ;;  %vm1737_vm7 = vcmask 785408  }
 0x589   : > { %v1597_v4 = vsel %vm1031_vm8, %v1596_v50, %v1571_v60  ;;  %v1528_v7 = vsel %vm3098_vm10, %v1527_v40, %v1523_v56  ;;  %v1599_v32 = vsel %vm1031_vm8, %v1583_v54, %v1598_v22 }
 0x58a   : > { %v1587_v6 = vsel %vm1031_vm8, %v1579_v62, %v1586_v1  ;;  %v1603_v9 = vperm.slane %v1597_v4, %v2909_v61  ;;  %v1553_v11 = vsel %vm1552_vm14, %v2204_v37, %v1549_v63  ;;  %v1584_v5 = vrot.slane %v1579_v62, 4 }
 0x58b   : > { %v1595_v10 = vperm.slane %v1587_v6, %v2909_v61  ;;  %v1558_v12 = vsel %vm1555_vm15, %v1557_v47, %v1553_v11  ;;  %v1619_v14 = vsel %vm1031_vm8, %v1528_v7, %v1618_v59  ;;  %v1616_v27 = vrot.slane %v1528_v7, 4 }
 0x58c   : > { %1685 = vrot.lane.b32.xlu1 %v1603_v9, %s2462_s23  ;;  %v1631_v15 = vsel %vm1031_vm8, %v1558_v12, %v1630_v46  ;;  %v1585_v17 = vsel %vm1031_vm8, %v1584_v5, %v1567_v52  ;;  %v1627_v19 = vperm.slane %v1619_v14, %v2900_v29  ;;  %v1612_v28 = vrot.slane %v1603_v9, 4  ;;  %v1751_v5 = vld.sshfl [vmem:[#allocation1 + $0x8] sm:$0xff pattern:$0x75316420] }
 0x58d   : > { %1677 = vrot.lane.b32.xlu0 %v1595_v10, %s2460_s21  ;;  %v1639_v57 = vperm.slane %v1631_v15, %v2900_v29  ;;  %v1591_v18 = vperm.slane %v1585_v17, %v2909_v61  ;;  %v1610_v26 = vrot.slane %v1595_v10, 4  ;;  %v1607_v33 = vperm.slane %v1599_v32, %v2909_v61 }
 0x58e   : > { %v1613_v30 = vsel %vm1031_vm8, 0.0, %v1612_v28  ;;  %v1654_v34 = vrot.slane %v1627_v19, 4  ;;  %v1617_v36 = vsel %vm1031_vm8, %v1616_v27, %v3094_v16  ;;  %v1628_v37 = vrot.slane %v1558_v12, 4 }
 0x58f   : > { %v1652_v20 = vrot.slane %v1639_v57, 4  ;;  %v1608_v8 = vrot.slane %v1591_v18, 4  ;;  %v1611_v13 = vsel %vm1031_vm8, 0.0, %v1610_v26  ;;  %v1623_v40 = vperm.slane %v1617_v36, %v2900_v29 }
 0x590   : > { %v1655_v39 = vsel %vm1031_vm8, %v1639_v57, %v1654_v34  ;;  %v1629_v41 = vsel %vm1031_vm8, %v1628_v37, %v1498_v55  ;;  %v1614_v54 = vrot.slane %v1607_v33, 4 }
 0x591   : > { %v1653_v21 = vsel %vm1031_vm8, %v1652_v20, %v1627_v19  ;;  %v1609_v24 = vsel %vm1031_vm8, 0.0, %v1608_v8  ;;  %v1663_v2 = vperm.slane %v1655_v39, %v2909_v61  ;;  %v1642_v35 = vrot.slane %v1623_v40, 4  ;;  %v1750_v20 = vld.sshfl [vmem:[#allocation1] sm:$0xff pattern:$0x75316420] }
 0x592   : > { %v1659_v25 = vperm.slane %v1653_v21, %v2909_v61  ;;  %v1635_v3 = vperm.slane %v1629_v41, %v2900_v29  ;;  %v1615_v55 = vsel %vm1031_vm8, 0.0, %v1614_v54  ;;  %v1763_v21 = vld [vmem:[#allocation4] sm:$0xff] }
 0x593   : > { %v1670_v44 = vrot.slane %v1663_v2, 4 }
 0x594   : > { %1713 = vrot.lane.b32.xlu2 %v1659_v25, %s2462_s23  ;;  %v1643_v23 = vsel %vm1031_vm8, %v1635_v3, %v1642_v35  ;;  %v1668_v16 = vrot.slane %v1659_v25, 4  ;;  %v1640_v38 = vrot.slane %v1635_v3, 4 }
 0x595   : > { %1673 = vrot.lane.b32.xlu0 %v1609_v24, %s2450_s24  ;;  %v1651_v42 = vperm.slane %v1643_v23, %v2909_v61  ;;  %v1671_v48 = vsel %vm1031_vm8, 0.0, %v1670_v44 }
 0x596   : > { %v1669_v43 = vsel %vm1031_vm8, 0.0, %v1668_v16  ;;  %v1641_v45 = vsel %vm1031_vm8, %v1640_v38, %v1623_v40 }
 0x597   : > { %v1647_v52 = vperm.slane %v1641_v45, %v2909_v61  ;;  %v1666_v51 = vrot.slane %v1651_v42, 4 }
 0x599   : > { %v1664_v29 = vrot.slane %v1647_v52, 4  ;;  %v1667_v53 = vsel %vm1031_vm8, 0.0, %v1666_v51 }
 0x59b   : > { %v1665_v49 = vsel %vm1031_vm8, 0.0, %v1664_v29  ;;  %vm1733_vm8 = vcmask 523264  }
 0x59d   : > { %1681 = vrot.lane.b32.xlu0 %v1611_v13, %s2461_s17  ;;  %v1748_v13 = vld [vmem:[#allocation3] sm:$0xff] }
 0x5a5   : > { %1689 = vrot.lane.b32.xlu0 %v1613_v30, %s2459_s20 }
 0x5ad   : > { %1693 = vrot.lane.b32.xlu0 %v1607_v33, %s2458_s18 }
 0x5b5   : > { %1721 = vrot.lane.b32.xlu0 %v1663_v2, %s2458_s18 }
 0x5bd   : > { %1705 = vrot.lane.b32.xlu0 %v1651_v42, %s2460_s21 }
 0x5c5   : > { %1717 = vrot.lane.b32.xlu0 %v1669_v43, %s2459_s20 }
 0x5cd   : > { %1725 = vrot.lane.b32.xlu0 %v1671_v48, %s2454_s19 }
 0x5d5   : > { %1701 = vrot.lane.b32.xlu0 %v1665_v49, %s2450_s24  ;;  %s3309_s24 = sld [smem:[#allocation17_spill]] }
 0x5db   : > { %p1949_p1 = scmp.ne.s32.totalorder %s3309_s24, 2 }
 0x5dd   : > { %1709 = vrot.lane.b32.xlu0 %v1667_v53, %s2461_s17 }
 0x5e5   : > { %1697 = vrot.lane.b32.xlu0 %v1615_v55, %s2454_s19 }
 0x5ee   : > { %v1714_v9 = vpop.permute.xlu2 %1713 }
 0x5fe   : > { %v1686_v15 = vpop.permute.xlu1 %1685 }
 0x5ff   : > { %v1678_v31 = vpop.permute.xlu0 %1677 }
 0x607   : > { %v1674_v61 = vpop.permute.xlu0 %1673 }
 0x608   : > { %v1728_v58 = vsel %vm1306_vm9, %v1591_v18, %v1674_v61 }
 0x609   : > { %v1730_v0 = vsel %vm1729_vm0, %v1728_v58, %v1678_v31 }
 0x60f   : > { %v1682_v1 = vpop.permute.xlu0 %1681 }
 0x610   : > { %v1732_v60 = vsel %vm1731_vm1, %v1730_v0, %v1682_v1 }
 0x611   : > { %v1734_v17 = vsel %vm1733_vm8, %v1732_v60, %v1686_v15 }
 0x617   : > { %v1690_v50 = vpop.permute.xlu0 %1689 }
 0x618   : > { %v1736_v19 = vsel %vm1735_vm2, %v1734_v17, %v1690_v50 }
 0x61f   : > { %v1694_v62 = vpop.permute.xlu0 %1693 }
 0x620   : > { %v1738_v8 = vsel %vm1737_vm7, %v1736_v19, %v1694_v62 }
 0x627   : > { %v1722_v56 = vpop.permute.xlu0 %1721 }
 0x62f   : > { %v1706_v63 = vpop.permute.xlu0 %1705 }
 0x637   : > { %v1718_v59 = vpop.permute.xlu0 %1717 }
 0x63f   : > { %v1726_v46 = vpop.permute.xlu0 %1725 }
 0x647   : > { %v1702_v47 = vpop.permute.xlu0 %1701 }
 0x648   : > { %v1741_v4 = vsel %vm1306_vm9, %v1647_v52, %v1702_v47 }
 0x649   : > { %v1742_v6 = vsel %vm1729_vm0, %v1741_v4, %v1706_v63 }
 0x64f   : > { %v1710_v7 = vpop.permute.xlu0 %1709 }
 0x650   : > { %v1743_v10 = vsel %vm1731_vm1, %v1742_v6, %v1710_v7 }
 0x651   : > { %v1744_v11 = vsel %vm1733_vm8, %v1743_v10, %v1714_v9 }
 0x652   : > { %v1745_v12 = vsel %vm1735_vm2, %v1744_v11, %v1718_v59 }
 0x653   : > { %v1746_v14 = vsel %vm1737_vm7, %v1745_v12, %v1722_v56 }
 0x654   : > { %v1747_v57 = vsel %vm1739_vm5, %v1746_v14, %v1726_v46 }
 0x655   : > { %v1755_v18 = vmul.f32 %v1751_v5, %v1747_v57  ;;  %v1766_v25 = vrot.slane %v1747_v57, 4 }
 0x657   : > { %v1698_v24 = vpop.permute.xlu0 %1697  ;;  %v1758_v28 = vrot.slane %v1755_v18, 4 }
 0x658   : > { %v1740_v26 = vsel %vm1739_vm5, %v1738_v8, %v1698_v24 }
 0x659   : > { %v1754_v30 = vmul.f32 %v1750_v20, %v1740_v26  ;;  %v1767_v22 = vsel %vm929_vm4, %v1740_v26, %v1766_v25 }
 0x65a   : > { %v1769_v32 = vadd.f32 %v1767_v22, %v1763_v21  ;;  %1774 = sbr.rel (%p1949_p1) target bundleno = 1648 (0x670), region = 68 }
 0x65b   : > { %v1759_v27 = vsel %vm929_vm4, %v1754_v30, %v1758_v28 }
 0x65c   : > { %v1761_v33 = vadd.f32 %v1759_v27, %v1748_v13  ;;  %1770 = vst [vmem:[#allocation4] sm:$0xff] %v1769_v32 }
 0x65e   : > { %1762 = vst [vmem:[#allocation3] sm:$0xff] %v1761_v33 }
 0x65f   : > { %v1779_v39 = vld [vmem:[%s2671_s30] sm:$0xff] }
 0x663   : > { %v1775_v34 = vld [vmem:[#allocation4] sm:$0xff] }
 0x664   : > { %2205 = vrcp.f32 %v1775_v34 }
 0x665   : > { %v1777_v36 = vld [vmem:[#allocation3] sm:$0xff] }
 0x66a   : > { %v2206_v37 = vpop.eup %2205 }
 0x66b   : > { %v1778_v40 = vmul.f32 %v2206_v37, %v1777_v36 }
 0x66d   : > { %v1780_v2 = vadd.f32 %v1779_v39, %v1778_v40 }
 0x66f   : > { %1781 = vst [vmem:[%s2698_s14] sm:$0xff] %v1780_v2 }
 0x670 PF: > { %s3310_s6 = sld [smem:[#allocation18_spill]]  ;;  %s1796_s16 = sshll.u32 %s2698_s14, 4  ;;  %s1797_s16 = int_to_ptr.vmem [resolvable:$true] %s1796_s16 }
 0x671   : > { %s3312_s2 = sld [smem:[#allocation29_spill]]  ;;  %s1783_s7 = scalar_lea.sflag [#allocation7], %s2667_s0 }
 0x676   : > { %s1956_s19 = sshll.u32 %s3310_s6, 3 }
 0x677   : > { %s1794_s3 = scalar_lea.hbm %s3312_s2, %s1956_s19  ;;  %s2317_s21 = scalar_lea.hbm %s3312_s2, 16 }
 0x678   : > { %s1798_s22 = sshll.u32 %s1794_s3, 4  ;;  %s1799_s22 = int_to_ptr.hbm [resolvable:$true] %s1798_s22 }
 0x679   : > { %s2311_s12 = sshra.s32 %s1799_s22, 4  ;;  %s2312_s12 = int_to_ptr.hbm [resolvable:$true] %s2311_s12 }
 0x67a   : > { %s2313_s30 = scalar_lea.hbm %s2312_s12, 8  ;;  %p2318_p8 = scmp.lt.s32.totalorder %s2312_s12, %s3312_s2 }
 0x67b   : > { %p2314_p12 = scmp.ne.s32.totalorder %s2312_s12, %s2313_s30  ;;  %p2319_p9 = scmp.lt.s32.totalorder %s2317_s21, %s2313_s30 }
 0x67d   : > { %p2315_p2 = pnand %p2314_p12, %p2598_p13  ;;  %p2320_p10 = por %p2319_p9, %p2318_p8 }
 0x67f   : > { %p2316_p6 = pneg %p2315_p2 }
 0x681   : > { %p2321_p11 = pnand %p2320_p10, %p2316_p6 }
 0x683   : > { %2324 = shalt.err (!%p2321_p11)
}
 0x684   : > { %1965 = dma.vmem_to_hbm [thread:$0]  (%p2598_p13), %s1797_s16, 128, %s1799_s22, %s1783_s7  }
 0x685 PF: > { %s3313_s0 = sld [smem:[#allocation16_spill]]  ;;  %p1985_p4 = scmp.ge.s32.totalorder %s2427_s11, 2 }
 0x687   : > { %p1979_p7 = pnand %p1985_p4, %p2602_p0 }
 0x689   : > { %p1980_p5 = pneg %p1979_p7 }
 0x68b   : > { %s1810_s24 = sand.u32 1, %s3313_s0  }
 0x68c   : > { %s1811_s6 = scalar_lea.sflag [#allocation7], %s1810_s24 }
 0x68d   : > { %2382 = dma.done.wait (%p1980_p5), %s1811_s6, 128  }
 0x68e   : > { %2384 = vsyncadd (%p1980_p5), %s1811_s6, 4294967168  ;;  %s26_s11 = sadd.s32 1, %s2427_s11   ;;  %s3315_s13 = sld [smem:[#allocation21_spill]] }
 0x68f   : > { %p23_p3 = scmp.ge.s32.totalorder %s26_s11, 8   ;;  %s3316_s19 = smov %s3332_s27 }
 0x690   : > { %s3317_s24 = smov %s2391_s25  ;;  %s3318_s25 = smov %s2395_s26 }
 0x691   : > { %s3319_s26 = smov %s2655_s8  ;;  %s3320_s27 = smov %s2403_s28 }
 0x692   : > { %s3321_s28 = smov %s2407_s29  ;;  %s3322_s29 = smov %s2652_s15 }
 0x693   : > { %s3323_s30 = smov %s2419_s9  ;;  %s3324_s8 = smov %s2423_s10 }
 0x694   : > { %s3325_s9 = smov %s3315_s13  ;;  %s3326_s10 = smov %s3316_s19 }
 0x695   :  { %25 = sbr.rel (!%p23_p3) target bundleno = 19 (0x13), region = 118 }
 0x69a   :  { %1817 = vsyncpa [#allocation6], 1 }
 0x69b   :  { %1819 = vsyncpa [#allocation6 + $0x1], 1 }
 0x69c   :  { %1820 = vsyncpa [#allocation9], 1 }
 0x69d   :  { %1822 = vsyncpa [#allocation9 + $0x1], 1 }
 0x69e   :  { %1823 = vsyncpa [#allocation7], 1 }
 0x69f   :  { %1825 = vsyncpa [#allocation7 + $0x1], 1 }

</bundles_post_ra>
